<compile_context>
chip_gen: v7x
topology: tpu7x:2x2x1
jax: 0.10.0
libtpu: 0.0.40
codegen_flags: <defaults>
</compile_context>

<pallas_src>
import math

import jax
import jax.numpy as jnp
import numpy as np
from jax import lax
from jax.experimental import pallas as pl
from jax.experimental.pallas import tpu as pltpu

NLV_BCD = 6   # module default; nlv_bcd - 1 = 5 pooling scales
# mfs_dim=25 from __init__ is unused by the PyTorch forward pass.


def _pool_params(i):
    k = i + 2
    return k, k // 2


def _vmem_capacity_bytes():
    """Physical VMEM per core, with a conservative fallback."""
    try:
        cap = int(pltpu.get_tpu_info().vmem_capacity_bytes)
        if cap > 0:
            return cap
    except Exception:
        pass
    return 64 << 20   # v7x per-TensorCore VMEM (smallest current generation)


def _plan_blocks(N, C, H, W, itemsize):
    """Pick (n_blk, c_blk, vmem_limit_bytes) from a live-set model.

    Live set per grid step ~= 2 * input block (double buffering)
                            + ~2.5 * block   (running col-max + per-scale temps),
    so one block gets ~1/5 of the usable VMEM budget.
    """
    cap = _vmem_capacity_bytes()
    budget = max(16 << 20, min(int(cap * 0.6), 100 << 20))
    block_budget = budget // 5

    per_chan = H * W * max(itemsize, 4)   # intermediates are f32 regardless

    # Channel block: a multiple of 128 (lane width) when possible, else full C.
    if C % 128 == 0:
        c_blk = 128
        while C % (c_blk * 2) == 0 and (c_blk * 2) * per_chan <= block_budget:
            c_blk *= 2
        c_blk = min(c_blk, C)
    else:
        c_blk = C   # small / odd channel counts: full channel dim (layout-legal)
        # TODO(synk): sub-divide odd C if it ever exceeds the VMEM budget at huge H*W.

    # Coarsen over N when per-step work is tiny (amortize ~0.35us/step), but
    # keep >= 2 grid steps so both v7x TensorCores get work.
    n_blk = 1
    while (N % (n_blk * 2) == 0
           and (n_blk * 2) * c_blk * per_chan <= min(block_budget, 2 << 20)
           and (N // (n_blk * 2)) * (C // c_blk) >= 2):
        n_blk *= 2

    # Megacore: if the grid collapsed to a single step, split channels when the
    # halved block is still lane-legal (a multiple of 128).
    if (N // n_blk) * (C // c_blk) < 2 and c_blk % 256 == 0:
        c_blk //= 2

    block_bytes = n_blk * c_blk * per_chan
    vmem_limit = budget
    if 5 * block_bytes > vmem_limit:          # mandatory minimum block is large
        vmem_limit = min(int(cap * 0.9), 5 * block_bytes)
    return n_blk, c_blk, vmem_limit


def _make_gdcb_kernel(H, W, nlv_bcd):
    n_lv = nlv_bcd - 1
    xs = [-math.log2(i + 2) for i in range(n_lv)]
    mean_x = sum(xs) / n_lv
    xc = [v - mean_x for v in xs]                  # X - meanX  (compile-time)
    inv_den = 1.0 / sum(v * v for v in xc)         # 1 / sum((X - meanX)^2)

    def kernel(x_ref, out_ref):
        # x_ref: (n_blk, H, W, c_blk) -- channels on lanes, W on sublanes,
        # (n, H) on leading dims.  col_max holds the k-wide stride-1 window max
        # along W, grown incrementally across scales: exactly one sublane-
        # shifted max per scale (total n_lv), everything else is leading-dim
        # addressing.
        col_max = None
        ys = []
        for i in range(n_lv):
            k, s = _pool_params(i)
            W1 = W - k + 1                         # stride-1 pooled cols
            Ho = (H - k) // s + 1                  # VALID strided output rows
            Wo = (W - k) // s + 1                  # VALID strided output cols

            # Extend the column-window max from k-1 to k; read the shifted tail
            # straight from the ref (no full-block live temporary).
            tail = x_ref[:, :, k - 1:W, :].astype(jnp.float32)     # (n, H, W1, c)
            if col_max is None:
                col_max = jnp.maximum(
                    x_ref[:, :, 0:W1, :].astype(jnp.float32), tail)
            else:
                col_max = jnp.maximum(col_max[:, :, 0:W1, :], tail)

            if s == 1:
                # Every position is an output position: k-1 leading-dim max
                # slices, then reduce rows (adds) and cols (one sublane reduce).
                H1 = H - k + 1
                hm = col_max[:, 0:H1]
                for dh in range(1, k):
                    hm = jnp.maximum(hm, col_max[:, dh:dh + H1])   # (n, H1, W1, c)
                rs = jnp.sum(hm, axis=1)                           # (n, W1, c)
                pooled = jnp.sum(rs, axis=1, keepdims=True)        # (n, 1, c)
            else:
                # Max-reduce only the strided VALID output rows (Ho rows,
                # ~2-3x fewer than H-k+1); leading-dim integer indexing only.
                rs = None
                for r in range(Ho):
                    base = r * s
                    m = col_max[:, base]
                    for dh in range(1, k):
                        m = jnp.maximum(m, col_max[:, base + dh])  # (n, W1, c)
                    rs = m if rs is None else rs + m
                # Strided VALID output columns: Wo-1 single-sublane extracts.
                pooled = rs[:, 0:1, :]
                for c0 in range(s, Wo * s, s):
                    pooled = pooled + rs[:, c0:c0 + 1, :]          # (n, 1, c)

            # y_i = log2(relu(sum) + 1), per channel.
            ys.append(jnp.log2(jnp.maximum(pooled, 0.0) + 1.0))    # (n, 1, c)

        mean_y = ys[0]
        for y in ys[1:]:
            mean_y = mean_y + y
        mean_y = mean_y * (1.0 / n_lv)

        num = (ys[0] - mean_y) * xc[0]
        for y, c in zip(ys[1:], xc[1:]):
            num = num + (y - mean_y) * c
        out_ref[...] = (num * inv_den).astype(out_ref.dtype)       # (n, 1, c)

    return kernel


def gdcb_forward(x, nlv_bcd=NLV_BCD, data_format="NCHW"):
    """x: (N, C, H, W) [or (N, H, W, C) with data_format='NHWC'] -> (N, C, 1, 1)."""
    if data_format == "NCHW":
        N, C, H, W = x.shape
        # One XLA transpose to put channels on lanes.  Callers that can supply
        # NHWC activations should pass data_format="NHWC" and skip this extra
        # HBM round-trip (it is the dominant overhead on bandwidth-bound v5e).
        # TODO(synk): fuse/elide this transpose (NHWC producer upstream or
        # in-kernel relayout) when the surrounding model is NCHW end-to-end.
        x_nhwc = jnp.transpose(x, (0, 2, 3, 1))                    # (N, H, W, C)
    elif data_format == "NHWC":
        N, H, W, C = x.shape
        x_nhwc = x
    else:
        raise ValueError(f"unsupported data_format: {data_format}")

    n_lv = nlv_bcd - 1
    if H < nlv_bcd or W < nlv_bcd:
        raise ValueError(
            f"GDCB needs H, W >= nlv_bcd={nlv_bcd} (largest pooling window); "
            f"got H={H}, W={W}")

    n_blk, c_blk, vmem_limit = _plan_blocks(N, C, H, W, x.dtype.itemsize)
    assert C % c_blk == 0 and N % n_blk == 0

    kernel = _make_gdcb_kernel(H, W, nlv_bcd)
    cost = pl.CostEstimate(
        flops=int(6 * n_lv * N * C * H * W),
        transcendentals=int(n_lv * N * C),
        bytes_accessed=int(N * C * H * W * x.dtype.itemsize + N * C * 4),
    )

    out = pl.pallas_call(
        kernel,
        out_shape=jax.ShapeDtypeStruct((N, 1, C), jnp.float32),
        grid=(N // n_blk, C // c_blk),
        in_specs=[pl.BlockSpec((n_blk, H, W, c_blk),
                               lambda n, cb: (n, 0, 0, cb))],
        out_specs=pl.BlockSpec((n_blk, 1, c_blk),
                               lambda n, cb: (n, 0, cb)),
        compiler_params=pltpu.CompilerParams(
            dimension_semantics=("parallel", "parallel"),
            vmem_limit_bytes=vmem_limit,
        ),
        cost_estimate=cost,
    )(x_nhwc)
    return out.reshape(N, C, 1, 1)


def gdcb_reference(x, nlv_bcd=NLV_BCD):
    """Pure-JAX reference mirroring the PyTorch forward (NCHW input)."""
    n_lv = nlv_bcd - 1
    sums = []
    for i in range(n_lv):
        k, s = _pool_params(i)
        pooled = lax.reduce_window(x, -jnp.inf, lax.max,
                                   (1, 1, k, k), (1, 1, s, s), "VALID")
        sums.append(jnp.sum(pooled, axis=(2, 3), keepdims=True))
    out = jnp.concatenate(sums, axis=2)                            # (N, C, n_lv, 1)
    out = jnp.log2(jnp.maximum(out, 0.0) + 1.0)
    X = jnp.array([-math.log2(i + 2) for i in range(n_lv)],
                  dtype=jnp.float32).reshape(1, 1, n_lv, 1)
    mean_x = jnp.mean(X, axis=2, keepdims=True)
    mean_y = jnp.mean(out, axis=2, keepdims=True)
    num = jnp.sum((out - mean_y) * (X - mean_x), axis=2, keepdims=True)
    den = jnp.sum((X - mean_x) ** 2, axis=2, keepdims=True)
    return num / den


if __name__ == "__main__":
    key = jax.random.PRNGKey(0)
    N, C, H, W = 2, 4, 16, 16
    x = jax.random.normal(key, (N, C, H, W), dtype=jnp.float32)

    out = jax.block_until_ready(gdcb_forward(x))
    ref = jax.block_until_ready(gdcb_reference(x))
    assert out.shape == (N, C, 1, 1), out.shape
    assert np.allclose(np.asarray(out), np.asarray(ref), rtol=1e-4, atol=1e-4), (
        "Pallas output does not match reference (NCHW path)")

    # Exercise the lane-tiled (C % 128 == 0) path, the megacore channel split,
    # and the transpose-free NHWC fast path.
    key2 = jax.random.PRNGKey(1)
    x2 = jax.random.normal(key2, (1, 256, 8, 8), dtype=jnp.float32)
    out2 = jax.block_until_ready(gdcb_forward(x2))
    ref2 = jax.block_until_ready(gdcb_reference(x2))
    assert np.allclose(np.asarray(out2), np.asarray(ref2), rtol=1e-4, atol=1e-4), (
        "Pallas output does not match reference (128-lane path)")

    x2_nhwc = jnp.transpose(x2, (0, 2, 3, 1))
    out3 = jax.block_until_ready(gdcb_forward(x2_nhwc, data_format="NHWC"))
    assert np.allclose(np.asarray(out3), np.asarray(ref2), rtol=1e-4, atol=1e-4), (
        "Pallas output does not match reference (NHWC path)")

    print("KERNEL_OK")
</pallas_src>

<mosaic_0001>
module attributes {stable_mosaic.version = 11 : i64} {
  func.func @kernel(%arg0: i32, %arg1: i32, %arg2: memref<1x16x16x4xf32, #tpu.memory_space<vmem>>, %arg3: memref<1x1x4xf32, #tpu.memory_space<vmem>>) attributes {dimension_semantics = [#tpu.dimension_semantics<parallel>, #tpu.dimension_semantics<parallel>], iteration_bounds = array<i64: 2, 1>, scalar_prefetch = 0 : i64, scratch_operands = 0 : i64, tpu.core_type = #tpu.core_type<tc>, window_params = [{transform_indices = @transform_0, window_bounds = array<i64: 1, 16, 16, 4>}, {transform_indices = @transform_1, window_bounds = array<i64: 1, 1, 4>}]} {
    %c0 = arith.constant 0 : index
    %c0_0 = arith.constant 0 : index
    %c1 = arith.constant 1 : index
    %c0_1 = arith.constant 0 : index
    %0 = vector.load %arg2[%c0, %c0_0, %c1, %c0_1] : memref<1x16x16x4xf32, #tpu.memory_space<vmem>>, vector<1x16x15x4xf32>
    %c0_2 = arith.constant 0 : index
    %c0_3 = arith.constant 0 : index
    %c0_4 = arith.constant 0 : index
    %c0_5 = arith.constant 0 : index
    %1 = vector.load %arg2[%c0_2, %c0_3, %c0_4, %c0_5] : memref<1x16x16x4xf32, #tpu.memory_space<vmem>>, vector<1x16x15x4xf32>
    %2 = arith.maximumf %1, %0 : vector<1x16x15x4xf32>
    %3 = vector.extract_strided_slice %2 {offsets = [0, 0, 0, 0], sizes = [1, 15, 15, 4], strides = [1, 1, 1, 1]} : vector<1x16x15x4xf32> to vector<1x15x15x4xf32>
    %4 = vector.extract_strided_slice %2 {offsets = [0, 1, 0, 0], sizes = [1, 15, 15, 4], strides = [1, 1, 1, 1]} : vector<1x16x15x4xf32> to vector<1x15x15x4xf32>
    %5 = arith.maximumf %3, %4 : vector<1x15x15x4xf32>
    %cst = arith.constant dense<0.000000e+00> : vector<1x15x4xf32>
    %6 = vector.multi_reduction <add>, %5, %cst [1] : vector<1x15x15x4xf32> to vector<1x15x4xf32>
    %cst_6 = arith.constant dense<0.000000e+00> : vector<1x4xf32>
    %7 = vector.multi_reduction <add>, %6, %cst_6 [1] : vector<1x15x4xf32> to vector<1x4xf32>
    %8 = vector.shape_cast %7 : vector<1x4xf32> to vector<1x1x4xf32>
    %cst_7 = arith.constant 0.000000e+00 : f32
    %9 = vector.broadcast %cst_7 : f32 to vector<1x1x4xf32>
    %10 = arith.maximumf %8, %9 : vector<1x1x4xf32>
    %cst_8 = arith.constant 1.000000e+00 : f32
    %11 = vector.broadcast %cst_8 : f32 to vector<1x1x4xf32>
    %12 = arith.addf %10, %11 : vector<1x1x4xf32>
    %13 = math.log %12 : vector<1x1x4xf32>
    %cst_9 = arith.constant 2.000000e+00 : f32
    %14 = math.log %cst_9 : f32
    %15 = vector.broadcast %14 : f32 to vector<1x1x4xf32>
    %16 = arith.divf %13, %15 : vector<1x1x4xf32>
    %c0_10 = arith.constant 0 : index
    %c0_11 = arith.constant 0 : index
    %c2 = arith.constant 2 : index
    %c0_12 = arith.constant 0 : index
    %17 = vector.load %arg2[%c0_10, %c0_11, %c2, %c0_12] : memref<1x16x16x4xf32, #tpu.memory_space<vmem>>, vector<1x16x14x4xf32>
    %18 = vector.extract_strided_slice %2 {offsets = [0, 0, 0, 0], sizes = [1, 16, 14, 4], strides = [1, 1, 1, 1]} : vector<1x16x15x4xf32> to vector<1x16x14x4xf32>
    %19 = arith.maximumf %18, %17 : vector<1x16x14x4xf32>
    %20 = vector.extract_strided_slice %19 {offsets = [0, 0, 0, 0], sizes = [1, 14, 14, 4], strides = [1, 1, 1, 1]} : vector<1x16x14x4xf32> to vector<1x14x14x4xf32>
    %21 = vector.extract_strided_slice %19 {offsets = [0, 1, 0, 0], sizes = [1, 14, 14, 4], strides = [1, 1, 1, 1]} : vector<1x16x14x4xf32> to vector<1x14x14x4xf32>
    %22 = arith.maximumf %20, %21 : vector<1x14x14x4xf32>
    %23 = vector.extract_strided_slice %19 {offsets = [0, 2, 0, 0], sizes = [1, 14, 14, 4], strides = [1, 1, 1, 1]} : vector<1x16x14x4xf32> to vector<1x14x14x4xf32>
    %24 = arith.maximumf %22, %23 : vector<1x14x14x4xf32>
    %cst_13 = arith.constant dense<0.000000e+00> : vector<1x14x4xf32>
    %25 = vector.multi_reduction <add>, %24, %cst_13 [1] : vector<1x14x14x4xf32> to vector<1x14x4xf32>
    %cst_14 = arith.constant dense<0.000000e+00> : vector<1x4xf32>
    %26 = vector.multi_reduction <add>, %25, %cst_14 [1] : vector<1x14x4xf32> to vector<1x4xf32>
    %27 = vector.shape_cast %26 : vector<1x4xf32> to vector<1x1x4xf32>
    %cst_15 = arith.constant 0.000000e+00 : f32
    %28 = vector.broadcast %cst_15 : f32 to vector<1x1x4xf32>
    %29 = arith.maximumf %27, %28 : vector<1x1x4xf32>
    %cst_16 = arith.constant 1.000000e+00 : f32
    %30 = vector.broadcast %cst_16 : f32 to vector<1x1x4xf32>
    %31 = arith.addf %29, %30 : vector<1x1x4xf32>
    %32 = math.log %31 : vector<1x1x4xf32>
    %cst_17 = arith.constant 2.000000e+00 : f32
    %33 = math.log %cst_17 : f32
    %34 = vector.broadcast %33 : f32 to vector<1x1x4xf32>
    %35 = arith.divf %32, %34 : vector<1x1x4xf32>
    %c0_18 = arith.constant 0 : index
    %c0_19 = arith.constant 0 : index
    %c3 = arith.constant 3 : index
    %c0_20 = arith.constant 0 : index
    %36 = vector.load %arg2[%c0_18, %c0_19, %c3, %c0_20] : memref<1x16x16x4xf32, #tpu.memory_space<vmem>>, vector<1x16x13x4xf32>
    %37 = vector.extract_strided_slice %19 {offsets = [0, 0, 0, 0], sizes = [1, 16, 13, 4], strides = [1, 1, 1, 1]} : vector<1x16x14x4xf32> to vector<1x16x13x4xf32>
    %38 = arith.maximumf %37, %36 : vector<1x16x13x4xf32>
    %39 = vector.extract_strided_slice %38 {offsets = [0, 0, 0, 0], sizes = [1, 1, 13, 4], strides = [1, 1, 1, 1]} : vector<1x16x13x4xf32> to vector<1x1x13x4xf32>
    %40 = vector.shape_cast %39 : vector<1x1x13x4xf32> to vector<1x13x4xf32>
    %41 = vector.extract_strided_slice %38 {offsets = [0, 1, 0, 0], sizes = [1, 1, 13, 4], strides = [1, 1, 1, 1]} : vector<1x16x13x4xf32> to vector<1x1x13x4xf32>
    %42 = vector.shape_cast %41 : vector<1x1x13x4xf32> to vector<1x13x4xf32>
    %43 = arith.maximumf %40, %42 : vector<1x13x4xf32>
    %44 = vector.extract_strided_slice %38 {offsets = [0, 2, 0, 0], sizes = [1, 1, 13, 4], strides = [1, 1, 1, 1]} : vector<1x16x13x4xf32> to vector<1x1x13x4xf32>
    %45 = vector.shape_cast %44 : vector<1x1x13x4xf32> to vector<1x13x4xf32>
    %46 = arith.maximumf %43, %45 : vector<1x13x4xf32>
    %47 = vector.extract_strided_slice %38 {offsets = [0, 3, 0, 0], sizes = [1, 1, 13, 4], strides = [1, 1, 1, 1]} : vector<1x16x13x4xf32> to vector<1x1x13x4xf32>
    %48 = vector.shape_cast %47 : vector<1x1x13x4xf32> to vector<1x13x4xf32>
    %49 = arith.maximumf %46, %48 : vector<1x13x4xf32>
    %50 = vector.extract_strided_slice %38 {offsets = [0, 2, 0, 0], sizes = [1, 1, 13, 4], strides = [1, 1, 1, 1]} : vector<1x16x13x4xf32> to vector<1x1x13x4xf32>
    %51 = vector.shape_cast %50 : vector<1x1x13x4xf32> to vector<1x13x4xf32>
    %52 = vector.extract_strided_slice %38 {offsets = [0, 3, 0, 0], sizes = [1, 1, 13, 4], strides = [1, 1, 1, 1]} : vector<1x16x13x4xf32> to vector<1x1x13x4xf32>
    %53 = vector.shape_cast %52 : vector<1x1x13x4xf32> to vector<1x13x4xf32>
    %54 = arith.maximumf %51, %53 : vector<1x13x4xf32>
    %55 = vector.extract_strided_slice %38 {offsets = [0, 4, 0, 0], sizes = [1, 1, 13, 4], strides = [1, 1, 1, 1]} : vector<1x16x13x4xf32> to vector<1x1x13x4xf32>
    %56 = vector.shape_cast %55 : vector<1x1x13x4xf32> to vector<1x13x4xf32>
    %57 = arith.maximumf %54, %56 : vector<1x13x4xf32>
    %58 = vector.extract_strided_slice %38 {offsets = [0, 5, 0, 0], sizes = [1, 1, 13, 4], strides = [1, 1, 1, 1]} : vector<1x16x13x4xf32> to vector<1x1x13x4xf32>
    %59 = vector.shape_cast %58 : vector<1x1x13x4xf32> to vector<1x13x4xf32>
    %60 = arith.maximumf %57, %59 : vector<1x13x4xf32>
    %61 = arith.addf %49, %60 : vector<1x13x4xf32>
    %62 = vector.extract_strided_slice %38 {offsets = [0, 4, 0, 0], sizes = [1, 1, 13, 4], strides = [1, 1, 1, 1]} : vector<1x16x13x4xf32> to vector<1x1x13x4xf32>
    %63 = vector.shape_cast %62 : vector<1x1x13x4xf32> to vector<1x13x4xf32>
    %64 = vector.extract_strided_slice %38 {offsets = [0, 5, 0, 0], sizes = [1, 1, 13, 4], strides = [1, 1, 1, 1]} : vector<1x16x13x4xf32> to vector<1x1x13x4xf32>
    %65 = vector.shape_cast %64 : vector<1x1x13x4xf32> to vector<1x13x4xf32>
    %66 = arith.maximumf %63, %65 : vector<1x13x4xf32>
    %67 = vector.extract_strided_slice %38 {offsets = [0, 6, 0, 0], sizes = [1, 1, 13, 4], strides = [1, 1, 1, 1]} : vector<1x16x13x4xf32> to vector<1x1x13x4xf32>
    %68 = vector.shape_cast %67 : vector<1x1x13x4xf32> to vector<1x13x4xf32>
    %69 = arith.maximumf %66, %68 : vector<1x13x4xf32>
    %70 = vector.extract_strided_slice %38 {offsets = [0, 7, 0, 0], sizes = [1, 1, 13, 4], strides = [1, 1, 1, 1]} : vector<1x16x13x4xf32> to vector<1x1x13x4xf32>
    %71 = vector.shape_cast %70 : vector<1x1x13x4xf32> to vector<1x13x4xf32>
    %72 = arith.maximumf %69, %71 : vector<1x13x4xf32>
    %73 = arith.addf %61, %72 : vector<1x13x4xf32>
    %74 = vector.extract_strided_slice %38 {offsets = [0, 6, 0, 0], sizes = [1, 1, 13, 4], strides = [1, 1, 1, 1]} : vector<1x16x13x4xf32> to vector<1x1x13x4xf32>
    %75 = vector.shape_cast %74 : vector<1x1x13x4xf32> to vector<1x13x4xf32>
    %76 = vector.extract_strided_slice %38 {offsets = [0, 7, 0, 0], sizes = [1, 1, 13, 4], strides = [1, 1, 1, 1]} : vector<1x16x13x4xf32> to vector<1x1x13x4xf32>
    %77 = vector.shape_cast %76 : vector<1x1x13x4xf32> to vector<1x13x4xf32>
    %78 = arith.maximumf %75, %77 : vector<1x13x4xf32>
    %79 = vector.extract_strided_slice %38 {offsets = [0, 8, 0, 0], sizes = [1, 1, 13, 4], strides = [1, 1, 1, 1]} : vector<1x16x13x4xf32> to vector<1x1x13x4xf32>
    %80 = vector.shape_cast %79 : vector<1x1x13x4xf32> to vector<1x13x4xf32>
    %81 = arith.maximumf %78, %80 : vector<1x13x4xf32>
    %82 = vector.extract_strided_slice %38 {offsets = [0, 9, 0, 0], sizes = [1, 1, 13, 4], strides = [1, 1, 1, 1]} : vector<1x16x13x4xf32> to vector<1x1x13x4xf32>
    %83 = vector.shape_cast %82 : vector<1x1x13x4xf32> to vector<1x13x4xf32>
    %84 = arith.maximumf %81, %83 : vector<1x13x4xf32>
    %85 = arith.addf %73, %84 : vector<1x13x4xf32>
    %86 = vector.extract_strided_slice %38 {offsets = [0, 8, 0, 0], sizes = [1, 1, 13, 4], strides = [1, 1, 1, 1]} : vector<1x16x13x4xf32> to vector<1x1x13x4xf32>
    %87 = vector.shape_cast %86 : vector<1x1x13x4xf32> to vector<1x13x4xf32>
    %88 = vector.extract_strided_slice %38 {offsets = [0, 9, 0, 0], sizes = [1, 1, 13, 4], strides = [1, 1, 1, 1]} : vector<1x16x13x4xf32> to vector<1x1x13x4xf32>
    %89 = vector.shape_cast %88 : vector<1x1x13x4xf32> to vector<1x13x4xf32>
    %90 = arith.maximumf %87, %89 : vector<1x13x4xf32>
    %91 = vector.extract_strided_slice %38 {offsets = [0, 10, 0, 0], sizes = [1, 1, 13, 4], strides = [1, 1, 1, 1]} : vector<1x16x13x4xf32> to vector<1x1x13x4xf32>
    %92 = vector.shape_cast %91 : vector<1x1x13x4xf32> to vector<1x13x4xf32>
    %93 = arith.maximumf %90, %92 : vector<1x13x4xf32>
    %94 = vector.extract_strided_slice %38 {offsets = [0, 11, 0, 0], sizes = [1, 1, 13, 4], strides = [1, 1, 1, 1]} : vector<1x16x13x4xf32> to vector<1x1x13x4xf32>
    %95 = vector.shape_cast %94 : vector<1x1x13x4xf32> to vector<1x13x4xf32>
    %96 = arith.maximumf %93, %95 : vector<1x13x4xf32>
    %97 = arith.addf %85, %96 : vector<1x13x4xf32>
    %98 = vector.extract_strided_slice %38 {offsets = [0, 10, 0, 0], sizes = [1, 1, 13, 4], strides = [1, 1, 1, 1]} : vector<1x16x13x4xf32> to vector<1x1x13x4xf32>
    %99 = vector.shape_cast %98 : vector<1x1x13x4xf32> to vector<1x13x4xf32>
    %100 = vector.extract_strided_slice %38 {offsets = [0, 11, 0, 0], sizes = [1, 1, 13, 4], strides = [1, 1, 1, 1]} : vector<1x16x13x4xf32> to vector<1x1x13x4xf32>
    %101 = vector.shape_cast %100 : vector<1x1x13x4xf32> to vector<1x13x4xf32>
    %102 = arith.maximumf %99, %101 : vector<1x13x4xf32>
    %103 = vector.extract_strided_slice %38 {offsets = [0, 12, 0, 0], sizes = [1, 1, 13, 4], strides = [1, 1, 1, 1]} : vector<1x16x13x4xf32> to vector<1x1x13x4xf32>
    %104 = vector.shape_cast %103 : vector<1x1x13x4xf32> to vector<1x13x4xf32>
    %105 = arith.maximumf %102, %104 : vector<1x13x4xf32>
    %106 = vector.extract_strided_slice %38 {offsets = [0, 13, 0, 0], sizes = [1, 1, 13, 4], strides = [1, 1, 1, 1]} : vector<1x16x13x4xf32> to vector<1x1x13x4xf32>
    %107 = vector.shape_cast %106 : vector<1x1x13x4xf32> to vector<1x13x4xf32>
    %108 = arith.maximumf %105, %107 : vector<1x13x4xf32>
    %109 = arith.addf %97, %108 : vector<1x13x4xf32>
    %110 = vector.extract_strided_slice %38 {offsets = [0, 12, 0, 0], sizes = [1, 1, 13, 4], strides = [1, 1, 1, 1]} : vector<1x16x13x4xf32> to vector<1x1x13x4xf32>
    %111 = vector.shape_cast %110 : vector<1x1x13x4xf32> to vector<1x13x4xf32>
    %112 = vector.extract_strided_slice %38 {offsets = [0, 13, 0, 0], sizes = [1, 1, 13, 4], strides = [1, 1, 1, 1]} : vector<1x16x13x4xf32> to vector<1x1x13x4xf32>
    %113 = vector.shape_cast %112 : vector<1x1x13x4xf32> to vector<1x13x4xf32>
    %114 = arith.maximumf %111, %113 : vector<1x13x4xf32>
    %115 = vector.extract_strided_slice %38 {offsets = [0, 14, 0, 0], sizes = [1, 1, 13, 4], strides = [1, 1, 1, 1]} : vector<1x16x13x4xf32> to vector<1x1x13x4xf32>
    %116 = vector.shape_cast %115 : vector<1x1x13x4xf32> to vector<1x13x4xf32>
    %117 = arith.maximumf %114, %116 : vector<1x13x4xf32>
    %118 = vector.extract_strided_slice %38 {offsets = [0, 15, 0, 0], sizes = [1, 1, 13, 4], strides = [1, 1, 1, 1]} : vector<1x16x13x4xf32> to vector<1x1x13x4xf32>
    %119 = vector.shape_cast %118 : vector<1x1x13x4xf32> to vector<1x13x4xf32>
    %120 = arith.maximumf %117, %119 : vector<1x13x4xf32>
    %121 = arith.addf %109, %120 : vector<1x13x4xf32>
    %122 = vector.extract_strided_slice %121 {offsets = [0, 0, 0], sizes = [1, 1, 4], strides = [1, 1, 1]} : vector<1x13x4xf32> to vector<1x1x4xf32>
    %123 = vector.extract_strided_slice %121 {offsets = [0, 2, 0], sizes = [1, 1, 4], strides = [1, 1, 1]} : vector<1x13x4xf32> to vector<1x1x4xf32>
    %124 = arith.addf %122, %123 : vector<1x1x4xf32>
    %125 = vector.extract_strided_slice %121 {offsets = [0, 4, 0], sizes = [1, 1, 4], strides = [1, 1, 1]} : vector<1x13x4xf32> to vector<1x1x4xf32>
    %126 = arith.addf %124, %125 : vector<1x1x4xf32>
    %127 = vector.extract_strided_slice %121 {offsets = [0, 6, 0], sizes = [1, 1, 4], strides = [1, 1, 1]} : vector<1x13x4xf32> to vector<1x1x4xf32>
    %128 = arith.addf %126, %127 : vector<1x1x4xf32>
    %129 = vector.extract_strided_slice %121 {offsets = [0, 8, 0], sizes = [1, 1, 4], strides = [1, 1, 1]} : vector<1x13x4xf32> to vector<1x1x4xf32>
    %130 = arith.addf %128, %129 : vector<1x1x4xf32>
    %131 = vector.extract_strided_slice %121 {offsets = [0, 10, 0], sizes = [1, 1, 4], strides = [1, 1, 1]} : vector<1x13x4xf32> to vector<1x1x4xf32>
    %132 = arith.addf %130, %131 : vector<1x1x4xf32>
    %133 = vector.extract_strided_slice %121 {offsets = [0, 12, 0], sizes = [1, 1, 4], strides = [1, 1, 1]} : vector<1x13x4xf32> to vector<1x1x4xf32>
    %134 = arith.addf %132, %133 : vector<1x1x4xf32>
    %cst_21 = arith.constant 0.000000e+00 : f32
    %135 = vector.broadcast %cst_21 : f32 to vector<1x1x4xf32>
    %136 = arith.maximumf %134, %135 : vector<1x1x4xf32>
    %cst_22 = arith.constant 1.000000e+00 : f32
    %137 = vector.broadcast %cst_22 : f32 to vector<1x1x4xf32>
    %138 = arith.addf %136, %137 : vector<1x1x4xf32>
    %139 = math.log %138 : vector<1x1x4xf32>
    %cst_23 = arith.constant 2.000000e+00 : f32
    %140 = math.log %cst_23 : f32
    %141 = vector.broadcast %140 : f32 to vector<1x1x4xf32>
    %142 = arith.divf %139, %141 : vector<1x1x4xf32>
    %c0_24 = arith.constant 0 : index
    %c0_25 = arith.constant 0 : index
    %c4 = arith.constant 4 : index
    %c0_26 = arith.constant 0 : index
    %143 = vector.load %arg2[%c0_24, %c0_25, %c4, %c0_26] : memref<1x16x16x4xf32, #tpu.memory_space<vmem>>, vector<1x16x12x4xf32>
    %144 = vector.extract_strided_slice %38 {offsets = [0, 0, 0, 0], sizes = [1, 16, 12, 4], strides = [1, 1, 1, 1]} : vector<1x16x13x4xf32> to vector<1x16x12x4xf32>
    %145 = arith.maximumf %144, %143 : vector<1x16x12x4xf32>
    %146 = vector.extract_strided_slice %145 {offsets = [0, 0, 0, 0], sizes = [1, 1, 12, 4], strides = [1, 1, 1, 1]} : vector<1x16x12x4xf32> to vector<1x1x12x4xf32>
    %147 = vector.shape_cast %146 : vector<1x1x12x4xf32> to vector<1x12x4xf32>
    %148 = vector.extract_strided_slice %145 {offsets = [0, 1, 0, 0], sizes = [1, 1, 12, 4], strides = [1, 1, 1, 1]} : vector<1x16x12x4xf32> to vector<1x1x12x4xf32>
    %149 = vector.shape_cast %148 : vector<1x1x12x4xf32> to vector<1x12x4xf32>
    %150 = arith.maximumf %147, %149 : vector<1x12x4xf32>
    %151 = vector.extract_strided_slice %145 {offsets = [0, 2, 0, 0], sizes = [1, 1, 12, 4], strides = [1, 1, 1, 1]} : vector<1x16x12x4xf32> to vector<1x1x12x4xf32>
    %152 = vector.shape_cast %151 : vector<1x1x12x4xf32> to vector<1x12x4xf32>
    %153 = arith.maximumf %150, %152 : vector<1x12x4xf32>
    %154 = vector.extract_strided_slice %145 {offsets = [0, 3, 0, 0], sizes = [1, 1, 12, 4], strides = [1, 1, 1, 1]} : vector<1x16x12x4xf32> to vector<1x1x12x4xf32>
    %155 = vector.shape_cast %154 : vector<1x1x12x4xf32> to vector<1x12x4xf32>
    %156 = arith.maximumf %153, %155 : vector<1x12x4xf32>
    %157 = vector.extract_strided_slice %145 {offsets = [0, 4, 0, 0], sizes = [1, 1, 12, 4], strides = [1, 1, 1, 1]} : vector<1x16x12x4xf32> to vector<1x1x12x4xf32>
    %158 = vector.shape_cast %157 : vector<1x1x12x4xf32> to vector<1x12x4xf32>
    %159 = arith.maximumf %156, %158 : vector<1x12x4xf32>
    %160 = vector.extract_strided_slice %145 {offsets = [0, 2, 0, 0], sizes = [1, 1, 12, 4], strides = [1, 1, 1, 1]} : vector<1x16x12x4xf32> to vector<1x1x12x4xf32>
    %161 = vector.shape_cast %160 : vector<1x1x12x4xf32> to vector<1x12x4xf32>
    %162 = vector.extract_strided_slice %145 {offsets = [0, 3, 0, 0], sizes = [1, 1, 12, 4], strides = [1, 1, 1, 1]} : vector<1x16x12x4xf32> to vector<1x1x12x4xf32>
    %163 = vector.shape_cast %162 : vector<1x1x12x4xf32> to vector<1x12x4xf32>
    %164 = arith.maximumf %161, %163 : vector<1x12x4xf32>
    %165 = vector.extract_strided_slice %145 {offsets = [0, 4, 0, 0], sizes = [1, 1, 12, 4], strides = [1, 1, 1, 1]} : vector<1x16x12x4xf32> to vector<1x1x12x4xf32>
    %166 = vector.shape_cast %165 : vector<1x1x12x4xf32> to vector<1x12x4xf32>
    %167 = arith.maximumf %164, %166 : vector<1x12x4xf32>
    %168 = vector.extract_strided_slice %145 {offsets = [0, 5, 0, 0], sizes = [1, 1, 12, 4], strides = [1, 1, 1, 1]} : vector<1x16x12x4xf32> to vector<1x1x12x4xf32>
    %169 = vector.shape_cast %168 : vector<1x1x12x4xf32> to vector<1x12x4xf32>
    %170 = arith.maximumf %167, %169 : vector<1x12x4xf32>
    %171 = vector.extract_strided_slice %145 {offsets = [0, 6, 0, 0], sizes = [1, 1, 12, 4], strides = [1, 1, 1, 1]} : vector<1x16x12x4xf32> to vector<1x1x12x4xf32>
    %172 = vector.shape_cast %171 : vector<1x1x12x4xf32> to vector<1x12x4xf32>
    %173 = arith.maximumf %170, %172 : vector<1x12x4xf32>
    %174 = arith.addf %159, %173 : vector<1x12x4xf32>
    %175 = vector.extract_strided_slice %145 {offsets = [0, 4, 0, 0], sizes = [1, 1, 12, 4], strides = [1, 1, 1, 1]} : vector<1x16x12x4xf32> to vector<1x1x12x4xf32>
    %176 = vector.shape_cast %175 : vector<1x1x12x4xf32> to vector<1x12x4xf32>
    %177 = vector.extract_strided_slice %145 {offsets = [0, 5, 0, 0], sizes = [1, 1, 12, 4], strides = [1, 1, 1, 1]} : vector<1x16x12x4xf32> to vector<1x1x12x4xf32>
    %178 = vector.shape_cast %177 : vector<1x1x12x4xf32> to vector<1x12x4xf32>
    %179 = arith.maximumf %176, %178 : vector<1x12x4xf32>
    %180 = vector.extract_strided_slice %145 {offsets = [0, 6, 0, 0], sizes = [1, 1, 12, 4], strides = [1, 1, 1, 1]} : vector<1x16x12x4xf32> to vector<1x1x12x4xf32>
    %181 = vector.shape_cast %180 : vector<1x1x12x4xf32> to vector<1x12x4xf32>
    %182 = arith.maximumf %179, %181 : vector<1x12x4xf32>
    %183 = vector.extract_strided_slice %145 {offsets = [0, 7, 0, 0], sizes = [1, 1, 12, 4], strides = [1, 1, 1, 1]} : vector<1x16x12x4xf32> to vector<1x1x12x4xf32>
    %184 = vector.shape_cast %183 : vector<1x1x12x4xf32> to vector<1x12x4xf32>
    %185 = arith.maximumf %182, %184 : vector<1x12x4xf32>
    %186 = vector.extract_strided_slice %145 {offsets = [0, 8, 0, 0], sizes = [1, 1, 12, 4], strides = [1, 1, 1, 1]} : vector<1x16x12x4xf32> to vector<1x1x12x4xf32>
    %187 = vector.shape_cast %186 : vector<1x1x12x4xf32> to vector<1x12x4xf32>
    %188 = arith.maximumf %185, %187 : vector<1x12x4xf32>
    %189 = arith.addf %174, %188 : vector<1x12x4xf32>
    %190 = vector.extract_strided_slice %145 {offsets = [0, 6, 0, 0], sizes = [1, 1, 12, 4], strides = [1, 1, 1, 1]} : vector<1x16x12x4xf32> to vector<1x1x12x4xf32>
    %191 = vector.shape_cast %190 : vector<1x1x12x4xf32> to vector<1x12x4xf32>
    %192 = vector.extract_strided_slice %145 {offsets = [0, 7, 0, 0], sizes = [1, 1, 12, 4], strides = [1, 1, 1, 1]} : vector<1x16x12x4xf32> to vector<1x1x12x4xf32>
    %193 = vector.shape_cast %192 : vector<1x1x12x4xf32> to vector<1x12x4xf32>
    %194 = arith.maximumf %191, %193 : vector<1x12x4xf32>
    %195 = vector.extract_strided_slice %145 {offsets = [0, 8, 0, 0], sizes = [1, 1, 12, 4], strides = [1, 1, 1, 1]} : vector<1x16x12x4xf32> to vector<1x1x12x4xf32>
    %196 = vector.shape_cast %195 : vector<1x1x12x4xf32> to vector<1x12x4xf32>
    %197 = arith.maximumf %194, %196 : vector<1x12x4xf32>
    %198 = vector.extract_strided_slice %145 {offsets = [0, 9, 0, 0], sizes = [1, 1, 12, 4], strides = [1, 1, 1, 1]} : vector<1x16x12x4xf32> to vector<1x1x12x4xf32>
    %199 = vector.shape_cast %198 : vector<1x1x12x4xf32> to vector<1x12x4xf32>
    %200 = arith.maximumf %197, %199 : vector<1x12x4xf32>
    %201 = vector.extract_strided_slice %145 {offsets = [0, 10, 0, 0], sizes = [1, 1, 12, 4], strides = [1, 1, 1, 1]} : vector<1x16x12x4xf32> to vector<1x1x12x4xf32>
    %202 = vector.shape_cast %201 : vector<1x1x12x4xf32> to vector<1x12x4xf32>
    %203 = arith.maximumf %200, %202 : vector<1x12x4xf32>
    %204 = arith.addf %189, %203 : vector<1x12x4xf32>
    %205 = vector.extract_strided_slice %145 {offsets = [0, 8, 0, 0], sizes = [1, 1, 12, 4], strides = [1, 1, 1, 1]} : vector<1x16x12x4xf32> to vector<1x1x12x4xf32>
    %206 = vector.shape_cast %205 : vector<1x1x12x4xf32> to vector<1x12x4xf32>
    %207 = vector.extract_strided_slice %145 {offsets = [0, 9, 0, 0], sizes = [1, 1, 12, 4], strides = [1, 1, 1, 1]} : vector<1x16x12x4xf32> to vector<1x1x12x4xf32>
    %208 = vector.shape_cast %207 : vector<1x1x12x4xf32> to vector<1x12x4xf32>
    %209 = arith.maximumf %206, %208 : vector<1x12x4xf32>
    %210 = vector.extract_strided_slice %145 {offsets = [0, 10, 0, 0], sizes = [1, 1, 12, 4], strides = [1, 1, 1, 1]} : vector<1x16x12x4xf32> to vector<1x1x12x4xf32>
    %211 = vector.shape_cast %210 : vector<1x1x12x4xf32> to vector<1x12x4xf32>
    %212 = arith.maximumf %209, %211 : vector<1x12x4xf32>
    %213 = vector.extract_strided_slice %145 {offsets = [0, 11, 0, 0], sizes = [1, 1, 12, 4], strides = [1, 1, 1, 1]} : vector<1x16x12x4xf32> to vector<1x1x12x4xf32>
    %214 = vector.shape_cast %213 : vector<1x1x12x4xf32> to vector<1x12x4xf32>
    %215 = arith.maximumf %212, %214 : vector<1x12x4xf32>
    %216 = vector.extract_strided_slice %145 {offsets = [0, 12, 0, 0], sizes = [1, 1, 12, 4], strides = [1, 1, 1, 1]} : vector<1x16x12x4xf32> to vector<1x1x12x4xf32>
    %217 = vector.shape_cast %216 : vector<1x1x12x4xf32> to vector<1x12x4xf32>
    %218 = arith.maximumf %215, %217 : vector<1x12x4xf32>
    %219 = arith.addf %204, %218 : vector<1x12x4xf32>
    %220 = vector.extract_strided_slice %145 {offsets = [0, 10, 0, 0], sizes = [1, 1, 12, 4], strides = [1, 1, 1, 1]} : vector<1x16x12x4xf32> to vector<1x1x12x4xf32>
    %221 = vector.shape_cast %220 : vector<1x1x12x4xf32> to vector<1x12x4xf32>
    %222 = vector.extract_strided_slice %145 {offsets = [0, 11, 0, 0], sizes = [1, 1, 12, 4], strides = [1, 1, 1, 1]} : vector<1x16x12x4xf32> to vector<1x1x12x4xf32>
    %223 = vector.shape_cast %222 : vector<1x1x12x4xf32> to vector<1x12x4xf32>
    %224 = arith.maximumf %221, %223 : vector<1x12x4xf32>
    %225 = vector.extract_strided_slice %145 {offsets = [0, 12, 0, 0], sizes = [1, 1, 12, 4], strides = [1, 1, 1, 1]} : vector<1x16x12x4xf32> to vector<1x1x12x4xf32>
    %226 = vector.shape_cast %225 : vector<1x1x12x4xf32> to vector<1x12x4xf32>
    %227 = arith.maximumf %224, %226 : vector<1x12x4xf32>
    %228 = vector.extract_strided_slice %145 {offsets = [0, 13, 0, 0], sizes = [1, 1, 12, 4], strides = [1, 1, 1, 1]} : vector<1x16x12x4xf32> to vector<1x1x12x4xf32>
    %229 = vector.shape_cast %228 : vector<1x1x12x4xf32> to vector<1x12x4xf32>
    %230 = arith.maximumf %227, %229 : vector<1x12x4xf32>
    %231 = vector.extract_strided_slice %145 {offsets = [0, 14, 0, 0], sizes = [1, 1, 12, 4], strides = [1, 1, 1, 1]} : vector<1x16x12x4xf32> to vector<1x1x12x4xf32>
    %232 = vector.shape_cast %231 : vector<1x1x12x4xf32> to vector<1x12x4xf32>
    %233 = arith.maximumf %230, %232 : vector<1x12x4xf32>
    %234 = arith.addf %219, %233 : vector<1x12x4xf32>
    %235 = vector.extract_strided_slice %234 {offsets = [0, 0, 0], sizes = [1, 1, 4], strides = [1, 1, 1]} : vector<1x12x4xf32> to vector<1x1x4xf32>
    %236 = vector.extract_strided_slice %234 {offsets = [0, 2, 0], sizes = [1, 1, 4], strides = [1, 1, 1]} : vector<1x12x4xf32> to vector<1x1x4xf32>
    %237 = arith.addf %235, %236 : vector<1x1x4xf32>
    %238 = vector.extract_strided_slice %234 {offsets = [0, 4, 0], sizes = [1, 1, 4], strides = [1, 1, 1]} : vector<1x12x4xf32> to vector<1x1x4xf32>
    %239 = arith.addf %237, %238 : vector<1x1x4xf32>
    %240 = vector.extract_strided_slice %234 {offsets = [0, 6, 0], sizes = [1, 1, 4], strides = [1, 1, 1]} : vector<1x12x4xf32> to vector<1x1x4xf32>
    %241 = arith.addf %239, %240 : vector<1x1x4xf32>
    %242 = vector.extract_strided_slice %234 {offsets = [0, 8, 0], sizes = [1, 1, 4], strides = [1, 1, 1]} : vector<1x12x4xf32> to vector<1x1x4xf32>
    %243 = arith.addf %241, %242 : vector<1x1x4xf32>
    %244 = vector.extract_strided_slice %234 {offsets = [0, 10, 0], sizes = [1, 1, 4], strides = [1, 1, 1]} : vector<1x12x4xf32> to vector<1x1x4xf32>
    %245 = arith.addf %243, %244 : vector<1x1x4xf32>
    %cst_27 = arith.constant 0.000000e+00 : f32
    %246 = vector.broadcast %cst_27 : f32 to vector<1x1x4xf32>
    %247 = arith.maximumf %245, %246 : vector<1x1x4xf32>
    %cst_28 = arith.constant 1.000000e+00 : f32
    %248 = vector.broadcast %cst_28 : f32 to vector<1x1x4xf32>
    %249 = arith.addf %247, %248 : vector<1x1x4xf32>
    %250 = math.log %249 : vector<1x1x4xf32>
    %cst_29 = arith.constant 2.000000e+00 : f32
    %251 = math.log %cst_29 : f32
    %252 = vector.broadcast %251 : f32 to vector<1x1x4xf32>
    %253 = arith.divf %250, %252 : vector<1x1x4xf32>
    %c0_30 = arith.constant 0 : index
    %c0_31 = arith.constant 0 : index
    %c5 = arith.constant 5 : index
    %c0_32 = arith.constant 0 : index
    %254 = vector.load %arg2[%c0_30, %c0_31, %c5, %c0_32] : memref<1x16x16x4xf32, #tpu.memory_space<vmem>>, vector<1x16x11x4xf32>
    %255 = vector.extract_strided_slice %145 {offsets = [0, 0, 0, 0], sizes = [1, 16, 11, 4], strides = [1, 1, 1, 1]} : vector<1x16x12x4xf32> to vector<1x16x11x4xf32>
    %256 = arith.maximumf %255, %254 : vector<1x16x11x4xf32>
    %257 = vector.extract_strided_slice %256 {offsets = [0, 0, 0, 0], sizes = [1, 1, 11, 4], strides = [1, 1, 1, 1]} : vector<1x16x11x4xf32> to vector<1x1x11x4xf32>
    %258 = vector.shape_cast %257 : vector<1x1x11x4xf32> to vector<1x11x4xf32>
    %259 = vector.extract_strided_slice %256 {offsets = [0, 1, 0, 0], sizes = [1, 1, 11, 4], strides = [1, 1, 1, 1]} : vector<1x16x11x4xf32> to vector<1x1x11x4xf32>
    %260 = vector.shape_cast %259 : vector<1x1x11x4xf32> to vector<1x11x4xf32>
    %261 = arith.maximumf %258, %260 : vector<1x11x4xf32>
    %262 = vector.extract_strided_slice %256 {offsets = [0, 2, 0, 0], sizes = [1, 1, 11, 4], strides = [1, 1, 1, 1]} : vector<1x16x11x4xf32> to vector<1x1x11x4xf32>
    %263 = vector.shape_cast %262 : vector<1x1x11x4xf32> to vector<1x11x4xf32>
    %264 = arith.maximumf %261, %263 : vector<1x11x4xf32>
    %265 = vector.extract_strided_slice %256 {offsets = [0, 3, 0, 0], sizes = [1, 1, 11, 4], strides = [1, 1, 1, 1]} : vector<1x16x11x4xf32> to vector<1x1x11x4xf32>
    %266 = vector.shape_cast %265 : vector<1x1x11x4xf32> to vector<1x11x4xf32>
    %267 = arith.maximumf %264, %266 : vector<1x11x4xf32>
    %268 = vector.extract_strided_slice %256 {offsets = [0, 4, 0, 0], sizes = [1, 1, 11, 4], strides = [1, 1, 1, 1]} : vector<1x16x11x4xf32> to vector<1x1x11x4xf32>
    %269 = vector.shape_cast %268 : vector<1x1x11x4xf32> to vector<1x11x4xf32>
    %270 = arith.maximumf %267, %269 : vector<1x11x4xf32>
    %271 = vector.extract_strided_slice %256 {offsets = [0, 5, 0, 0], sizes = [1, 1, 11, 4], strides = [1, 1, 1, 1]} : vector<1x16x11x4xf32> to vector<1x1x11x4xf32>
    %272 = vector.shape_cast %271 : vector<1x1x11x4xf32> to vector<1x11x4xf32>
    %273 = arith.maximumf %270, %272 : vector<1x11x4xf32>
    %274 = vector.extract_strided_slice %256 {offsets = [0, 3, 0, 0], sizes = [1, 1, 11, 4], strides = [1, 1, 1, 1]} : vector<1x16x11x4xf32> to vector<1x1x11x4xf32>
    %275 = vector.shape_cast %274 : vector<1x1x11x4xf32> to vector<1x11x4xf32>
    %276 = vector.extract_strided_slice %256 {offsets = [0, 4, 0, 0], sizes = [1, 1, 11, 4], strides = [1, 1, 1, 1]} : vector<1x16x11x4xf32> to vector<1x1x11x4xf32>
    %277 = vector.shape_cast %276 : vector<1x1x11x4xf32> to vector<1x11x4xf32>
    %278 = arith.maximumf %275, %277 : vector<1x11x4xf32>
    %279 = vector.extract_strided_slice %256 {offsets = [0, 5, 0, 0], sizes = [1, 1, 11, 4], strides = [1, 1, 1, 1]} : vector<1x16x11x4xf32> to vector<1x1x11x4xf32>
    %280 = vector.shape_cast %279 : vector<1x1x11x4xf32> to vector<1x11x4xf32>
    %281 = arith.maximumf %278, %280 : vector<1x11x4xf32>
    %282 = vector.extract_strided_slice %256 {offsets = [0, 6, 0, 0], sizes = [1, 1, 11, 4], strides = [1, 1, 1, 1]} : vector<1x16x11x4xf32> to vector<1x1x11x4xf32>
    %283 = vector.shape_cast %282 : vector<1x1x11x4xf32> to vector<1x11x4xf32>
    %284 = arith.maximumf %281, %283 : vector<1x11x4xf32>
    %285 = vector.extract_strided_slice %256 {offsets = [0, 7, 0, 0], sizes = [1, 1, 11, 4], strides = [1, 1, 1, 1]} : vector<1x16x11x4xf32> to vector<1x1x11x4xf32>
    %286 = vector.shape_cast %285 : vector<1x1x11x4xf32> to vector<1x11x4xf32>
    %287 = arith.maximumf %284, %286 : vector<1x11x4xf32>
    %288 = vector.extract_strided_slice %256 {offsets = [0, 8, 0, 0], sizes = [1, 1, 11, 4], strides = [1, 1, 1, 1]} : vector<1x16x11x4xf32> to vector<1x1x11x4xf32>
    %289 = vector.shape_cast %288 : vector<1x1x11x4xf32> to vector<1x11x4xf32>
    %290 = arith.maximumf %287, %289 : vector<1x11x4xf32>
    %291 = arith.addf %273, %290 : vector<1x11x4xf32>
    %292 = vector.extract_strided_slice %256 {offsets = [0, 6, 0, 0], sizes = [1, 1, 11, 4], strides = [1, 1, 1, 1]} : vector<1x16x11x4xf32> to vector<1x1x11x4xf32>
    %293 = vector.shape_cast %292 : vector<1x1x11x4xf32> to vector<1x11x4xf32>
    %294 = vector.extract_strided_slice %256 {offsets = [0, 7, 0, 0], sizes = [1, 1, 11, 4], strides = [1, 1, 1, 1]} : vector<1x16x11x4xf32> to vector<1x1x11x4xf32>
    %295 = vector.shape_cast %294 : vector<1x1x11x4xf32> to vector<1x11x4xf32>
    %296 = arith.maximumf %293, %295 : vector<1x11x4xf32>
    %297 = vector.extract_strided_slice %256 {offsets = [0, 8, 0, 0], sizes = [1, 1, 11, 4], strides = [1, 1, 1, 1]} : vector<1x16x11x4xf32> to vector<1x1x11x4xf32>
    %298 = vector.shape_cast %297 : vector<1x1x11x4xf32> to vector<1x11x4xf32>
    %299 = arith.maximumf %296, %298 : vector<1x11x4xf32>
    %300 = vector.extract_strided_slice %256 {offsets = [0, 9, 0, 0], sizes = [1, 1, 11, 4], strides = [1, 1, 1, 1]} : vector<1x16x11x4xf32> to vector<1x1x11x4xf32>
    %301 = vector.shape_cast %300 : vector<1x1x11x4xf32> to vector<1x11x4xf32>
    %302 = arith.maximumf %299, %301 : vector<1x11x4xf32>
    %303 = vector.extract_strided_slice %256 {offsets = [0, 10, 0, 0], sizes = [1, 1, 11, 4], strides = [1, 1, 1, 1]} : vector<1x16x11x4xf32> to vector<1x1x11x4xf32>
    %304 = vector.shape_cast %303 : vector<1x1x11x4xf32> to vector<1x11x4xf32>
    %305 = arith.maximumf %302, %304 : vector<1x11x4xf32>
    %306 = vector.extract_strided_slice %256 {offsets = [0, 11, 0, 0], sizes = [1, 1, 11, 4], strides = [1, 1, 1, 1]} : vector<1x16x11x4xf32> to vector<1x1x11x4xf32>
    %307 = vector.shape_cast %306 : vector<1x1x11x4xf32> to vector<1x11x4xf32>
    %308 = arith.maximumf %305, %307 : vector<1x11x4xf32>
    %309 = arith.addf %291, %308 : vector<1x11x4xf32>
    %310 = vector.extract_strided_slice %256 {offsets = [0, 9, 0, 0], sizes = [1, 1, 11, 4], strides = [1, 1, 1, 1]} : vector<1x16x11x4xf32> to vector<1x1x11x4xf32>
    %311 = vector.shape_cast %310 : vector<1x1x11x4xf32> to vector<1x11x4xf32>
    %312 = vector.extract_strided_slice %256 {offsets = [0, 10, 0, 0], sizes = [1, 1, 11, 4], strides = [1, 1, 1, 1]} : vector<1x16x11x4xf32> to vector<1x1x11x4xf32>
    %313 = vector.shape_cast %312 : vector<1x1x11x4xf32> to vector<1x11x4xf32>
    %314 = arith.maximumf %311, %313 : vector<1x11x4xf32>
    %315 = vector.extract_strided_slice %256 {offsets = [0, 11, 0, 0], sizes = [1, 1, 11, 4], strides = [1, 1, 1, 1]} : vector<1x16x11x4xf32> to vector<1x1x11x4xf32>
    %316 = vector.shape_cast %315 : vector<1x1x11x4xf32> to vector<1x11x4xf32>
    %317 = arith.maximumf %314, %316 : vector<1x11x4xf32>
    %318 = vector.extract_strided_slice %256 {offsets = [0, 12, 0, 0], sizes = [1, 1, 11, 4], strides = [1, 1, 1, 1]} : vector<1x16x11x4xf32> to vector<1x1x11x4xf32>
    %319 = vector.shape_cast %318 : vector<1x1x11x4xf32> to vector<1x11x4xf32>
    %320 = arith.maximumf %317, %319 : vector<1x11x4xf32>
    %321 = vector.extract_strided_slice %256 {offsets = [0, 13, 0, 0], sizes = [1, 1, 11, 4], strides = [1, 1, 1, 1]} : vector<1x16x11x4xf32> to vector<1x1x11x4xf32>
    %322 = vector.shape_cast %321 : vector<1x1x11x4xf32> to vector<1x11x4xf32>
    %323 = arith.maximumf %320, %322 : vector<1x11x4xf32>
    %324 = vector.extract_strided_slice %256 {offsets = [0, 14, 0, 0], sizes = [1, 1, 11, 4], strides = [1, 1, 1, 1]} : vector<1x16x11x4xf32> to vector<1x1x11x4xf32>
    %325 = vector.shape_cast %324 : vector<1x1x11x4xf32> to vector<1x11x4xf32>
    %326 = arith.maximumf %323, %325 : vector<1x11x4xf32>
    %327 = arith.addf %309, %326 : vector<1x11x4xf32>
    %328 = vector.extract_strided_slice %327 {offsets = [0, 0, 0], sizes = [1, 1, 4], strides = [1, 1, 1]} : vector<1x11x4xf32> to vector<1x1x4xf32>
    %329 = vector.extract_strided_slice %327 {offsets = [0, 3, 0], sizes = [1, 1, 4], strides = [1, 1, 1]} : vector<1x11x4xf32> to vector<1x1x4xf32>
    %330 = arith.addf %328, %329 : vector<1x1x4xf32>
    %331 = vector.extract_strided_slice %327 {offsets = [0, 6, 0], sizes = [1, 1, 4], strides = [1, 1, 1]} : vector<1x11x4xf32> to vector<1x1x4xf32>
    %332 = arith.addf %330, %331 : vector<1x1x4xf32>
    %333 = vector.extract_strided_slice %327 {offsets = [0, 9, 0], sizes = [1, 1, 4], strides = [1, 1, 1]} : vector<1x11x4xf32> to vector<1x1x4xf32>
    %334 = arith.addf %332, %333 : vector<1x1x4xf32>
    %cst_33 = arith.constant 0.000000e+00 : f32
    %335 = vector.broadcast %cst_33 : f32 to vector<1x1x4xf32>
    %336 = arith.maximumf %334, %335 : vector<1x1x4xf32>
    %cst_34 = arith.constant 1.000000e+00 : f32
    %337 = vector.broadcast %cst_34 : f32 to vector<1x1x4xf32>
    %338 = arith.addf %336, %337 : vector<1x1x4xf32>
    %339 = math.log %338 : vector<1x1x4xf32>
    %cst_35 = arith.constant 2.000000e+00 : f32
    %340 = math.log %cst_35 : f32
    %341 = vector.broadcast %340 : f32 to vector<1x1x4xf32>
    %342 = arith.divf %339, %341 : vector<1x1x4xf32>
    %343 = arith.addf %16, %35 : vector<1x1x4xf32>
    %344 = arith.addf %343, %142 : vector<1x1x4xf32>
    %345 = arith.addf %344, %253 : vector<1x1x4xf32>
    %346 = arith.addf %345, %342 : vector<1x1x4xf32>
    %cst_36 = arith.constant 2.000000e-01 : f32
    %347 = vector.broadcast %cst_36 : f32 to vector<1x1x4xf32>
    %348 = arith.mulf %346, %347 : vector<1x1x4xf32>
    %349 = arith.subf %16, %348 : vector<1x1x4xf32>
    %cst_37 = arith.constant 0.898370623 : f32
    %350 = vector.broadcast %cst_37 : f32 to vector<1x1x4xf32>
    %351 = arith.mulf %349, %350 : vector<1x1x4xf32>
    %352 = arith.subf %35, %348 : vector<1x1x4xf32>
    %cst_38 = arith.constant 0.313408107 : f32
    %353 = vector.broadcast %cst_38 : f32 to vector<1x1x4xf32>
    %354 = arith.mulf %352, %353 : vector<1x1x4xf32>
    %355 = arith.addf %351, %354 : vector<1x1x4xf32>
    %356 = arith.subf %142, %348 : vector<1x1x4xf32>
    %cst_39 = arith.constant -0.101629384 : f32
    %357 = vector.broadcast %cst_39 : f32 to vector<1x1x4xf32>
    %358 = arith.mulf %356, %357 : vector<1x1x4xf32>
    %359 = arith.addf %355, %358 : vector<1x1x4xf32>
    %360 = arith.subf %253, %348 : vector<1x1x4xf32>
    %cst_40 = arith.constant -0.42355749 : f32
    %361 = vector.broadcast %cst_40 : f32 to vector<1x1x4xf32>
    %362 = arith.mulf %360, %361 : vector<1x1x4xf32>
    %363 = arith.addf %359, %362 : vector<1x1x4xf32>
    %364 = arith.subf %342, %348 : vector<1x1x4xf32>
    %cst_41 = arith.constant -0.686591864 : f32
    %365 = vector.broadcast %cst_41 : f32 to vector<1x1x4xf32>
    %366 = arith.mulf %364, %365 : vector<1x1x4xf32>
    %367 = arith.addf %363, %366 : vector<1x1x4xf32>
    %cst_42 = arith.constant 0.638393402 : f32
    %368 = vector.broadcast %cst_42 : f32 to vector<1x1x4xf32>
    %369 = arith.mulf %367, %368 : vector<1x1x4xf32>
    %c0_43 = arith.constant 0 : index
    %c0_44 = arith.constant 0 : index
    %c0_45 = arith.constant 0 : index
    %370 = vector.load %arg3[%c0_43, %c0_44, %c0_45] : memref<1x1x4xf32, #tpu.memory_space<vmem>>, vector<1x1x4xf32>
    tpu.vector_store %arg3[%c0_43, %c0_44, %c0_45], %369 {strides = array<i32>} : memref<1x1x4xf32, #tpu.memory_space<vmem>>, vector<1x1x4xf32>,
    return
  }
  func.func @transform_0(%arg0: i32, %arg1: i32) -> (i32, i32, i32, i32) {
    %c0_i32 = arith.constant 0 : i32
    %c0_i32_0 = arith.constant 0 : i32
    %c0_i32_1 = arith.constant 0 : i32
    return %arg0, %c0_i32, %c0_i32_0, %arg1 : i32, i32, i32, i32
  }
  func.func @transform_1(%arg0: i32, %arg1: i32) -> (i32, i32, i32) {
    %c0_i32 = arith.constant 0 : i32
    %c0_i32_0 = arith.constant 0 : i32
    return %arg0, %c0_i32, %arg1 : i32, i32, i32
  }
}

</mosaic_0001>

<bundles_post_ra>
// kernel: tpu_custom_call.1
= control target key start
LH: loop header
LB: loop body
LE: loop exit
PB: predicated region body
PF: predicated region fallthrough
CT: control target
= control target key end

     0   :  { %6 = vsyncpa [#allocation3], 0  ;;  %s2350_s0 = inlined_call_operand.vmem [shape: f32[2,16,16,4], index: 0, kind: input, shape index: {}]   ;;  %s2351_s1 = inlined_call_operand.hbm [shape: f32[2,1,4], index: 1, kind: output, shape index: {}]  }
   0x1   :  { %8 = vsyncpa [#allocation3 + $0x1], 0  ;;  %s1203_s6 = smov 0   ;;  %s1205_s7 = smov 0  }
   0x2   :  { %s1207_s8 = smov 0   ;;  %s1209_s9 = smov 0  }
   0x3   :  { %s1211_s10 = smov 0   ;;  %s1213_s11 = smov 0  }
   0x4 LB: > { %s1036_s12 = sadd.s32 4294967295, %s1190_s11   ;;  %s1037_s13 = sadd.s32 4294967294, %s1190_s11   ;;  %s1190_s11 = sphi %s1213_s11, %s14_s11   ;;  %s1186_s10 = sphi %s1211_s10, %s2435_s10   ;;  %s1182_s9 = sphi %s1209_s9, %s2434_s9   ;;  %s1178_s8 = sphi %s1207_s8, %s2433_s8   ;;  %s1174_s7 = sphi %s1205_s7, %s2432_s7   ;;  %s1170_s6 = sphi %s1203_s6, %s2431_s6  }
   0x5   : > { %s26_s14 = sadd.s32 1, %s1186_s10  ;;  %s63_s15 = sadd.s32 1, %s1178_s8 }
   0x6   : > { %p28_p0 = scmp.ge.s32.totalorder %s26_s14, 2  ;;  %p73_p1 = scmp.ne.s32.totalorder %s1178_s8, %s1174_s7 }
   0x7   : > { %p74_p2 = scmp.eq.s32.totalorder %s1036_s12, 1  ;;  %p79_p3 = scmp.ne.s32.totalorder %s1174_s7, %s1170_s6 }
   0x8   : > { %s2437_s14 = smov (%p28_p0, %s26_s14), 0  ;;  %p80_p5 = scmp.eq.s32.totalorder %s1037_s13, 1 }
   0x9   : > { %p1243_p4 = por %p74_p2, %p73_p1  ;;  %s58_s17 = ssub.s32 %s1186_s10, %s2437_s14 }
   0xa   : > { %p1040_p6 = scmp.ge.s32.totalorder %s1190_s11, 1  ;;  %p61_p7 = scmp.eq.s32.totalorder %s58_s17, 0 }
   0xb   : > { %p1250_p8 = por %p80_p5, %p79_p3  ;;  %p109_p9 = scmp.lt.s32.totalorder %s1190_s11, 3 }
   0xc   : > { %s1256_s19 = scalar_select %p61_p7, %s1178_s8, %s63_s15  }
   0xd   : > { %p110_p10 = pnand %p1040_p6, %p109_p9 }
   0xf   : > { %113 = sbr.rel (%p110_p10) target bundleno = 243 (0xf3), region = 24 }
  0x16   : > { %p131_p11 = scmp.lt.s32.totalorder %s1182_s9, 1  ;;  %vm265_vm0 = vcmask 31744   ;;  %vm295_vm1 = vcmask 30720   ;;  %vm487_vm2 = vcmask 29696   ;;  %s129_s25 = sand.u32 1, %s1174_s7   ;;  %vm950_vm3 = vcmask 24576  }
  0x17   : > { %s1043_s26 = sshll.u32 %s1182_s9, 4  ;;  %s130_s27 = scalar_lea.vmem [#allocation2], %s129_s25 }
  0x18   : > { %s132_s20 = scalar_select %p131_p11, %s1182_s9, 1 }
  0x19   : > { %s966_s28 = sshll.u32 %s130_s27, 4  ;;  %s2303_s2 = scalar_lea.hbm %s2351_s1, %s1043_s26  ;;  %s2305_s28 = int_to_ptr.vmem [resolvable:$true] %s966_s28 }
  0x1a   : > { %s1046_s21 = sshll.u32 %s132_s20, 8  ;;  %s953_s3 = scalar_lea.sflag [#allocation3], %s129_s25 }
  0x1b   : > { %s1263_s24 = scalar_lea.vmem %s2350_s0, %s1046_s21  ;;  %s1112_s4 = scalar_lea.vmem %s2305_s28, 16 }
  0x1c   : > { %v139_v0 = vld [vmem:[%s1263_s24 + $0x1] sm:$0xff]  ;;  %v140_v1 = vld [vmem:[%s1263_s24 + $0x9] sm:$0x7f]  ;;  %v141_v2 = vld [vmem:[%s1263_s24 + $0x11] sm:$0xff]  ;;  %p1113_p12 = scmp.ne.s32.totalorder %s2305_s28, %s1112_s4  ;;  %s1192_s5 = smov [#allocation2]  }
  0x1d   : > { %v142_v3 = vld [vmem:[%s1263_s24 + $0x19] sm:$0x7f]  ;;  %v143_v4 = vld [vmem:[%s1263_s24 + $0x21] sm:$0xff]  ;;  %v144_v5 = vld [vmem:[%s1263_s24 + $0x29] sm:$0x7f]  ;;  %s1116_s9 = sshll.u32 %s1192_s5, 4  ;;  %s1117_s9 = int_to_ptr.vmem [resolvable:$false] %s1116_s9 }
  0x1e   : > { %v145_v6 = vld [vmem:[%s1263_s24 + $0x31] sm:$0xff]  ;;  %v146_v7 = vld [vmem:[%s1263_s24 + $0x39] sm:$0x7f]  ;;  %v147_v8 = vld [vmem:[%s1263_s24 + $0x41] sm:$0xff]  ;;  %p1114_p13 = pnand %p1113_p12, %p1243_p4  ;;  %s1118_s12 = scalar_lea.vmem %s1117_s9, 32 }
  0x1f   : > { %v148_v9 = vld [vmem:[%s1263_s24 + $0x49] sm:$0x7f]  ;;  %v171_v10 = vld [vmem:[%s1263_s24] sm:$0xff]  ;;  %v149_v11 = vld [vmem:[%s1263_s24 + $0x51] sm:$0xff]  ;;  %p1119_p1 = scmp.lt.s32.totalorder %s2305_s28, %s1117_s9  ;;  %p1120_p2 = scmp.lt.s32.totalorder %s1118_s12, %s1112_s4 }
  0x20   : > { %v150_v12 = vld [vmem:[%s1263_s24 + $0x59] sm:$0x7f]  ;;  %v151_v13 = vld [vmem:[%s1263_s24 + $0x61] sm:$0xff]  ;;  %v173_v15 = vld [vmem:[%s1263_s24 + $0x10] sm:$0xff]  ;;  %v1294_v29 = vmax.f32 %v171_v10, %v139_v0  ;;  %p1115_p0 = pneg %p1114_p13 }
  0x21   : > { %v172_v14 = vld [vmem:[%s1263_s24 + $0x8] sm:$0x7f]  ;;  %v174_v16 = vld [vmem:[%s1263_s24 + $0x18] sm:$0x7f]  ;;  %v175_v20 = vld [vmem:[%s1263_s24 + $0x20] sm:$0xff]  ;;  %v1304_v37 = vmax.f32 %v173_v15, %v141_v2  ;;  %p1121_p3 = por %p1120_p2, %p1119_p1 }
  0x22   : > { %v152_v17 = vld [vmem:[%s1263_s24 + $0x69] sm:$0x7f]  ;;  %v153_v18 = vld [vmem:[%s1263_s24 + $0x71] sm:$0xff]  ;;  %v154_v19 = vld [vmem:[%s1263_s24 + $0x79] sm:$0x7f]  ;;  %v1296_v30 = vmax.f32 %v172_v14, %v140_v1  ;;  %v1306_v38 = vmax.f32 %v174_v16, %v142_v3  ;;  %v1308_v39 = vmax.f32 %v175_v20, %v143_v4 }
  0x23   : > { %v176_v21 = vld [vmem:[%s1263_s24 + $0x28] sm:$0x7f]  ;;  %v177_v22 = vld [vmem:[%s1263_s24 + $0x30] sm:$0xff]  ;;  %v178_v26 = vld [vmem:[%s1263_s24 + $0x38] sm:$0x7f]  ;;  %v235_v60 = vmax.f32 %v1294_v29, %v1304_v37  ;;  %p1122_p5 = pnand %p1121_p3, %p1115_p0 }
  0x24   : > { %v155_v23 = vld [vmem:[%s1263_s24 + $0x81] sm:$0xff]  ;;  %v156_v24 = vld [vmem:[%s1263_s24 + $0x89] sm:$0x7f]  ;;  %v157_v25 = vld [vmem:[%s1263_s24 + $0x91] sm:$0xff]  ;;  %v1310_v40 = vmax.f32 %v176_v21, %v144_v5  ;;  %v1318_v47 = vmax.f32 %v177_v22, %v145_v6  ;;  %v1320_v48 = vmax.f32 %v178_v26, %v146_v7  ;;  %v237_v14 = vmax.f32 %v1304_v37, %v1308_v39 }
  0x25   : > { %v179_v27 = vld [vmem:[%s1263_s24 + $0x40] sm:$0xff]  ;;  %v180_v28 = vld [vmem:[%s1263_s24 + $0x48] sm:$0x7f]  ;;  %v158_v31 = vld [vmem:[%s1263_s24 + $0x99] sm:$0x7f] }
  0x26   : > { %v159_v32 = vld [vmem:[%s1263_s24 + $0xa1] sm:$0xff]  ;;  %v160_v33 = vld [vmem:[%s1263_s24 + $0xa9] sm:$0x7f]  ;;  %v181_v34 = vld [vmem:[%s1263_s24 + $0x50] sm:$0xff]  ;;  %v1322_v49 = vmax.f32 %v179_v27, %v147_v8  ;;  %v1324_v50 = vmax.f32 %v180_v28, %v148_v9  ;;  %v238_v21 = vmax.f32 %v1306_v38, %v1310_v40  ;;  %v239_v28 = vmax.f32 %v1308_v39, %v1318_v47 }
  0x27   : > { %v182_v35 = vld [vmem:[%s1263_s24 + $0x58] sm:$0x7f]  ;;  %v183_v36 = vld [vmem:[%s1263_s24 + $0x60] sm:$0xff]  ;;  %v184_v44 = vld [vmem:[%s1263_s24 + $0x68] sm:$0x7f]  ;;  %v1332_v57 = vmax.f32 %v181_v34, %v149_v11 }
  0x28   : > { %v161_v41 = vld [vmem:[%s1263_s24 + $0xb1] sm:$0xff]  ;;  %v162_v42 = vld [vmem:[%s1263_s24 + $0xb9] sm:$0x7f]  ;;  %v163_v43 = vld [vmem:[%s1263_s24 + $0xc1] sm:$0xff]  ;;  %v1334_v58 = vmax.f32 %v182_v35, %v150_v12  ;;  %v1336_v59 = vmax.f32 %v183_v36, %v151_v13  ;;  %v1346_v3 = vmax.f32 %v184_v44, %v152_v17  ;;  %v240_v35 = vmax.f32 %v1310_v40, %v1320_v48 }
  0x29   : > { %v185_v45 = vld [vmem:[%s1263_s24 + $0x70] sm:$0xff]  ;;  %v186_v46 = vld [vmem:[%s1263_s24 + $0x78] sm:$0x7f]  ;;  %v164_v51 = vld [vmem:[%s1263_s24 + $0xc9] sm:$0x7f] }
  0x2a   : > { %v165_v52 = vld [vmem:[%s1263_s24 + $0xd1] sm:$0xff]  ;;  %v166_v53 = vld [vmem:[%s1263_s24 + $0xd9] sm:$0x7f]  ;;  %v187_v54 = vld [vmem:[%s1263_s24 + $0x80] sm:$0xff]  ;;  %v1348_v4 = vmax.f32 %v185_v45, %v153_v18  ;;  %v1350_v5 = vmax.f32 %v186_v46, %v154_v19  ;;  %v242_v45 = vmax.f32 %v1320_v48, %v1324_v50  ;;  %v243_v46 = vmax.f32 %v1322_v49, %v1332_v57 }
  0x2b   : > { %v188_v55 = vld [vmem:[%s1263_s24 + $0x88] sm:$0x7f]  ;;  %v189_v56 = vld [vmem:[%s1263_s24 + $0x90] sm:$0xff]  ;;  %v190_v0 = vld [vmem:[%s1263_s24 + $0x98] sm:$0x7f]  ;;  %v1358_v11 = vmax.f32 %v187_v54, %v155_v23 }
  0x2c   : > { %v167_v61 = vld [vmem:[%s1263_s24 + $0xe1] sm:$0xff]  ;;  %v168_v62 = vld [vmem:[%s1263_s24 + $0xe9] sm:$0x7f]  ;;  %v169_v63 = vld [vmem:[%s1263_s24 + $0xf1] sm:$0xff]  ;;  %v1360_v12 = vmax.f32 %v188_v55, %v156_v24  ;;  %v1362_v13 = vmax.f32 %v189_v56, %v157_v25  ;;  %v1369_v18 = vmax.f32 %v190_v0, %v158_v31  ;;  %v247_v54 = vmax.f32 %v1336_v59, %v1348_v4 }
  0x2d   : > { %v191_v1 = vld [vmem:[%s1263_s24 + $0xa0] sm:$0xff]  ;;  %v192_v2 = vld [vmem:[%s1263_s24 + $0xa8] sm:$0x7f]  ;;  %v170_v7 = vld [vmem:[%s1263_s24 + $0xf9] sm:$0x7f]  ;;  %v248_v55 = vmax.f32 %v1346_v3, %v1350_v5  ;;  %v249_v56 = vmax.f32 %v1348_v4, %v1358_v11 }
  0x2e   : > { %v193_v8 = vld [vmem:[%s1263_s24 + $0xb0] sm:$0xff]  ;;  %v194_v9 = vld [vmem:[%s1263_s24 + $0xb8] sm:$0x7f]  ;;  %v195_v10 = vld [vmem:[%s1263_s24 + $0xc0] sm:$0xff]  ;;  %v1371_v19 = vmax.f32 %v191_v1, %v159_v32  ;;  %v1373_v20 = vmax.f32 %v192_v2, %v160_v33 }
  0x2f   : > { %v196_v15 = vld [vmem:[%s1263_s24 + $0xc8] sm:$0x7f]  ;;  %v197_v16 = vld [vmem:[%s1263_s24 + $0xd0] sm:$0xff]  ;;  %v198_v17 = vld [vmem:[%s1263_s24 + $0xd8] sm:$0x7f]  ;;  %v1380_v25 = vmax.f32 %v193_v8, %v161_v41  ;;  %v1382_v26 = vmax.f32 %v194_v9, %v162_v42  ;;  %v1384_v27 = vmax.f32 %v195_v10, %v163_v43  ;;  %v241_v43 = vmax.f32 %v1318_v47, %v1322_v49 }
  0x30   : > { %v199_v22 = vld [vmem:[%s1263_s24 + $0xe0] sm:$0xff]  ;;  %v200_v23 = vld [vmem:[%s1263_s24 + $0xe8] sm:$0x7f]  ;;  %v201_v24 = vld [vmem:[%s1263_s24 + $0xf0] sm:$0xff]  ;;  %v1389_v32 = vmax.f32 %v196_v15, %v164_v51  ;;  %v1391_v33 = vmax.f32 %v197_v16, %v165_v52  ;;  %v1393_v34 = vmax.f32 %v198_v17, %v166_v53  ;;  %v244_v51 = vmax.f32 %v1324_v50, %v1334_v58 }
  0x31   : > { %2377 = vst [vmem:[#allocation5_spill] sm:$0xff] %v1382_v26  ;;  %2378 = vst [vmem:[#allocation6_spill] sm:$0xff] %v1384_v27  ;;  %v202_v31 = vld [vmem:[%s1263_s24 + $0xf8] sm:$0x7f]  ;;  %v1397_v36 = vmax.f32 %v199_v22, %v167_v61  ;;  %v1399_v41 = vmax.f32 %v200_v23, %v168_v62  ;;  %v1401_v42 = vmax.f32 %v201_v24, %v169_v63  ;;  %v266_v15 = vsel %vm265_vm0, %v235_v60, 0.0 }
  0x32   : > { %2379 = vst [vmem:[#allocation7_spill] sm:$0xff] %v1389_v32  ;;  %2380 = vst [vmem:[#allocation8_spill] sm:$0xff] %v1391_v33  ;;  %v1405_v44 = vmax.f32 %v202_v31, %v170_v7  ;;  %v245_v52 = vmax.f32 %v1332_v57, %v1336_v59  ;;  %v246_v53 = vmax.f32 %v1334_v58, %v1346_v3  ;;  %v267_v22 = vsel %vm265_vm0, %v237_v14, 0.0 }
  0x33   : > { %2381 = vst [vmem:[#allocation9_spill] sm:$0xff] %v1393_v34  ;;  %2382 = vst [vmem:[#allocation10_spill] sm:$0xff] %v1401_v42  ;;  %v250_v61 = vmax.f32 %v1350_v5, %v1360_v12  ;;  %v251_v62 = vmax.f32 %v1358_v11, %v1362_v13  ;;  %v252_v63 = vmax.f32 %v1360_v12, %v1369_v18  ;;  %v269_v23 = vsel %vm265_vm0, %v239_v28, 0.0 }
  0x34   : > { %v253_v0 = vmax.f32 %v1362_v13, %v1371_v19  ;;  %v254_v1 = vmax.f32 %v1369_v18, %v1373_v20  ;;  %v255_v2 = vmax.f32 %v1371_v19, %v1380_v25  ;;  %v256_v7 = vmax.f32 %v1373_v20, %v1382_v26 }
  0x35   : > { %v257_v8 = vmax.f32 %v1380_v25, %v1384_v27  ;;  %v258_v9 = vmax.f32 %v1382_v26, %v1389_v32  ;;  %v259_v10 = vmax.f32 %v1384_v27, %v1391_v33  ;;  %v260_v16 = vmax.f32 %v1389_v32, %v1393_v34 }
  0x36   : > { %v261_v17 = vmax.f32 %v1391_v33, %v1397_v36  ;;  %v262_v24 = vmax.f32 %v1393_v34, %v1399_v41  ;;  %v263_v31 = vmax.f32 %v1397_v36, %v1401_v42  ;;  %v264_v6 = vmax.f32 %v1399_v41, %v1405_v44 }
  0x37   : > { %v268_v60 = vadd.f32 %v267_v22, %v266_v15  ;;  %v271_v27 = vsel %vm265_vm0, %v241_v43, 0.0  ;;  %v273_v32 = vsel %vm265_vm0, %v243_v46, 0.0  ;;  %v275_v33 = vsel %vm265_vm0, %v245_v52, 0.0 }
  0x38   : > { %v277_v14 = vsel %vm265_vm0, %v247_v54, 0.0  ;;  %v279_v28 = vsel %vm265_vm0, %v249_v56, 0.0  ;;  %v1465_v34 = vsel %vm265_vm0, %v251_v62, 0.0  ;;  %v1468_v42 = vsel %vm265_vm0, %v253_v0, 0.0 }
  0x39   : > { %v270_v26 = vadd.f32 %v269_v23, %v268_v60  ;;  %v1471_v15 = vsel %vm265_vm0, %v255_v2, 0.0  ;;  %v2383_v43 = vmax.f32 %v1296_v30, %v1306_v38  ;;  %v297_v52 = vsel %vm295_vm1, %v238_v21, 0.0  ;;  %v341_v60 = vld [vmem:[%s1263_s24 + $0xa] sm:$0x3f] }
  0x3a   : > { %v299_v54 = vsel %vm295_vm1, %v240_v35, 0.0  ;;  %v1480_v62 = vsel %vm265_vm0, %v257_v8, 0.0  ;;  %v1483_v0 = vsel %vm265_vm0, %v259_v10, 0.0  ;;  %v1486_v22 = vsel %vm265_vm0, %v261_v17, 0.0  ;;  %v340_v17 = vld [vmem:[%s1263_s24 + $0x2] sm:$0xff] }
  0x3b   : > { %v296_v46 = vsel %vm295_vm1, %v2383_v43, 0.0  ;;  %v272_v56 = vadd.f32 %v271_v27, %v270_v26  ;;  %v1489_v23 = vsel %vm265_vm0, %v263_v31, 0.0  ;;  %v301_v21 = vsel %vm295_vm1, %v242_v45, 0.0  ;;  %v342_v43 = vld [vmem:[%s1263_s24 + $0x12] sm:$0xff] }
  0x3c   : > { %v298_v2 = vadd.f32 %v297_v52, %v296_v46  ;;  %2384 = vst [vmem:[#allocation11_spill] sm:$0xff] %v1489_v23  ;;  %v303_v35 = vsel %vm295_vm1, %v244_v51, 0.0  ;;  %v305_v8 = vsel %vm295_vm1, %v246_v53, 0.0  ;;  %v307_v10 = vsel %vm295_vm1, %v248_v55, 0.0  ;;  %v343_v46 = vld [vmem:[%s1263_s24 + $0x1a] sm:$0x3f] }
  0x3d   : > { %v274_v26 = vadd.f32 %v273_v32, %v272_v56  ;;  %v309_v31 = vsel %vm295_vm1, %v250_v61, 0.0  ;;  %v1501_v45 = vsel %vm295_vm1, %v252_v63, 0.0  ;;  %v1504_v32 = vsel %vm295_vm1, %v254_v1, 0.0  ;;  %v345_v53 = vld [vmem:[%s1263_s24 + $0x2a] sm:$0x3f]  ;;  %v344_v63 = vld [vmem:[%s1263_s24 + $0x22] sm:$0xff] }
  0x3e   : > { %v300_v27 = vadd.f32 %v299_v54, %v298_v2  ;;  %v1507_v51 = vsel %vm295_vm1, %v256_v7, 0.0  ;;  %v1511_v54 = vsel %vm295_vm1, %v258_v9, 0.0  ;;  %v1514_v61 = vsel %vm295_vm1, %v260_v16, 0.0  ;;  %v346_v56 = vld [vmem:[%s1263_s24 + $0x32] sm:$0xff]  ;;  %v347_v1 = vld [vmem:[%s1263_s24 + $0x3a] sm:$0x3f] }
  0x3f   : > { %v276_v52 = vadd.f32 %v275_v33, %v274_v26  ;;  %2385 = vst [vmem:[#allocation12_spill] sm:$0xff] %v1514_v61  ;;  %v1520_v7 = vsel %vm295_vm1, %v262_v24, 0.0  ;;  %v1523_v33 = vsel %vm295_vm1, %v264_v6, 0.0  ;;  %v348_v2 = vld [vmem:[%s1263_s24 + $0x42] sm:$0xff]  ;;  %v350_v9 = vld [vmem:[%s1263_s24 + $0x52] sm:$0xff]  ;;  %v1529_v26 = vmax.f32 %v1294_v29, %v340_v17 }
  0x40   : > { %v302_v55 = vadd.f32 %v301_v21, %v300_v27  ;;  %2386 = vst [vmem:[#allocation13_spill] sm:$0xff] %v1520_v7  ;;  %2387 = vst [vmem:[#allocation14_spill] sm:$0xff] %v1523_v33  ;;  %v349_v21 = vld [vmem:[%s1263_s24 + $0x4a] sm:$0x3f]  ;;  %v1532_v16 = vmax.f32 %v1296_v30, %v341_v60  ;;  %v351_v23 = vld [vmem:[%s1263_s24 + $0x5a] sm:$0x3f]  ;;  %v1538_v6 = vmax.f32 %v1304_v37, %v342_v43 }
  0x41   : > { %2388 = vst [vmem:[#allocation15_spill] sm:$0xff] %v1529_v26  ;;  %v278_v27 = vadd.f32 %v277_v14, %v276_v52  ;;  %v352_v24 = vld [vmem:[%s1263_s24 + $0x62] sm:$0xff]  ;;  %v353_v7 = vld [vmem:[%s1263_s24 + $0x6a] sm:$0x3f]  ;;  %v1541_v33 = vmax.f32 %v1306_v38, %v343_v46  ;;  %v354_v29 = vld [vmem:[%s1263_s24 + $0x72] sm:$0xff]  ;;  %v1547_v14 = vmax.f32 %v1308_v39, %v344_v63  ;;  %v1553_v17 = vmax.f32 %v1318_v47, %v346_v56 }
  0x42   : > { %2389 = vst [vmem:[#allocation16_spill] sm:$0xff] %v1532_v16  ;;  %v304_v61 = vadd.f32 %v303_v35, %v302_v55  ;;  %2390 = vst [vmem:[#allocation17_spill] sm:$0xff] %v1538_v6  ;;  %v355_v30 = vld [vmem:[%s1263_s24 + $0x7a] sm:$0x3f]  ;;  %v356_v60 = vld [vmem:[%s1263_s24 + $0x82] sm:$0xff]  ;;  %v1550_v35 = vmax.f32 %v1310_v40, %v345_v53  ;;  %v1556_v37 = vmax.f32 %v1320_v48, %v347_v1 }
  0x43   : > { %2391 = vst [vmem:[#allocation18_spill] sm:$0xff] %v1541_v33  ;;  %v280_v43 = vadd.f32 %v279_v28, %v278_v27  ;;  %v357_v46 = vld [vmem:[%s1263_s24 + $0x8a] sm:$0x3f]  ;;  %v358_v52 = vld [vmem:[%s1263_s24 + $0x92] sm:$0xff]  ;;  %v359_v55 = vld [vmem:[%s1263_s24 + $0x9a] sm:$0x3f]  ;;  %v1562_v39 = vmax.f32 %v1322_v49, %v348_v2  ;;  %v1565_v40 = vmax.f32 %v1324_v50, %v349_v21  ;;  %v1571_v28 = vmax.f32 %v1332_v57, %v350_v9 }
  0x44   : > { %v306_v38 = vadd.f32 %v305_v8, %v304_v61  ;;  %v360_v47 = vld [vmem:[%s1263_s24 + $0xa2] sm:$0xff]  ;;  %v361_v48 = vld [vmem:[%s1263_s24 + $0xaa] sm:$0x3f]  ;;  %v362_v53 = vld [vmem:[%s1263_s24 + $0xb2] sm:$0xff]  ;;  %v1574_v8 = vmax.f32 %v1334_v58, %v351_v23  ;;  %v1577_v61 = vmax.f32 %v1336_v59, %v352_v24  ;;  %v1580_v49 = vmax.f32 %v1346_v3, %v353_v7 }
  0x45   : > { %v282_v50 = vadd.f32 %v1465_v34, %v280_v43  ;;  %v363_v56 = vld [vmem:[%s1263_s24 + $0xba] sm:$0x3f]  ;;  %v364_v1 = vld [vmem:[%s1263_s24 + $0xc2] sm:$0xff]  ;;  %v365_v2 = vld [vmem:[%s1263_s24 + $0xca] sm:$0x3f]  ;;  %v1587_v57 = vmax.f32 %v1348_v4, %v354_v29  ;;  %v1590_v58 = vmax.f32 %v1350_v5, %v355_v30  ;;  %v1596_v3 = vmax.f32 %v1358_v11, %v356_v60 }
  0x46   : > { %v308_v63 = vadd.f32 %v307_v10, %v306_v38  ;;  %v366_v59 = vld [vmem:[%s1263_s24 + $0xd2] sm:$0xff]  ;;  %v367_v23 = vld [vmem:[%s1263_s24 + $0xda] sm:$0x3f]  ;;  %v368_v21 = vld [vmem:[%s1263_s24 + $0xe2] sm:$0xff]  ;;  %v1599_v34 = vmax.f32 %v1360_v12, %v357_v46  ;;  %v1602_v10 = vmax.f32 %v1362_v13, %v358_v52  ;;  %v1605_v7 = vmax.f32 %v1369_v18, %v359_v55 }
  0x47   : > { %v284_v4 = vadd.f32 %v1468_v42, %v282_v50  ;;  %v369_v5 = vld [vmem:[%s1263_s24 + $0xea] sm:$0x3f]  ;;  %v370_v27 = vld [vmem:[%s1263_s24 + $0xf2] sm:$0xff]  ;;  %v371_v24 = vld [vmem:[%s1263_s24 + $0xfa] sm:$0x3f]  ;;  %v1612_v29 = vmax.f32 %v1371_v19, %v360_v47  ;;  %v1615_v11 = vmax.f32 %v1373_v20, %v361_v48  ;;  %v1618_v12 = vmax.f32 %v1380_v25, %v362_v53 }
  0x48   : > { %v310_v9 = vadd.f32 %v309_v31, %v308_v63  ;;  %v2395_v13 = vld [vmem:[#allocation5_spill] sm:$0xff]  ;;  %v2397_v18 = vld [vmem:[#allocation6_spill] sm:$0xff]  ;;  %v2399_v42 = vld [vmem:[#allocation7_spill] sm:$0xff]  ;;  %v1638_v25 = vmax.f32 %v1397_v36, %v368_v21  ;;  %v1641_v55 = vmax.f32 %v1399_v41, %v369_v5  ;;  %v1647_v53 = vmax.f32 %v1405_v44, %v371_v24 }
  0x49   : > { %2392 = vst [vmem:[#allocation19_spill] sm:$0xff] %v1612_v29  ;;  %2393 = vst [vmem:[#allocation20_spill] sm:$0xff] %v1615_v11  ;;  %v1621_v30 = vmax.f32 %v2395_v13, %v363_v56  ;;  %v1624_v60 = vmax.f32 %v2397_v18, %v364_v1  ;;  %v1627_v31 = vmax.f32 %v2399_v42, %v365_v2  ;;  %v2400_v38 = vld [vmem:[#allocation8_spill] sm:$0xff]  ;;  %v2402_v20 = vld [vmem:[#allocation9_spill] sm:$0xff] }
  0x4a   : > { %2394 = vst [vmem:[#allocation21_spill] sm:$0xff] %v1618_v12  ;;  %v286_v43 = vadd.f32 %v1471_v15, %v284_v4  ;;  %v312_v19 = vadd.f32 %v1501_v45, %v310_v9  ;;  %v1632_v46 = vmax.f32 %v2400_v38, %v366_v59  ;;  %v1635_v52 = vmax.f32 %v2402_v20, %v367_v23  ;;  %v2405_v47 = vld [vmem:[#allocation10_spill] sm:$0xff]  ;;  %v2408_v18 = vld [vmem:[#allocation11_spill] sm:$0xff]  ;;  %v2409_v42 = vld [vmem:[#allocation12_spill] sm:$0xff] }
  0x4b   : > { %2396 = vst [vmem:[#allocation5_spill] sm:$0xff] %v1621_v30  ;;  %2398 = vst [vmem:[#allocation6_spill] sm:$0xff] %v1624_v60  ;;  %v1644_v48 = vmax.f32 %v2405_v47, %v370_v27  ;;  %v404_v50 = vmax.f32 %v1529_v26, %v1538_v6  ;;  %v405_v36 = vmax.f32 %v1532_v16, %v1541_v33 }
  0x4c   : > { %2401 = vst [vmem:[#allocation7_spill] sm:$0xff] %v1632_v46  ;;  %2403 = vst [vmem:[#allocation8_spill] sm:$0xff] %v1638_v25  ;;  %v288_v15 = vadd.f32 %v1480_v62, %v286_v43  ;;  %v314_v45 = vadd.f32 %v1504_v32, %v312_v19  ;;  %v406_v41 = vmax.f32 %v1538_v6, %v1547_v14 }
  0x4d   : > { %2404 = vst [vmem:[#allocation9_spill] sm:$0xff] %v1641_v55  ;;  %2406 = vst [vmem:[#allocation10_spill] sm:$0xff] %v1644_v48  ;;  %v407_v63 = vmax.f32 %v1541_v33, %v1550_v35  ;;  %v408_v44 = vmax.f32 %v1547_v14, %v1553_v17  ;;  %v409_v62 = vmax.f32 %v1550_v35, %v1556_v37 }
  0x4e   : > { %2407 = vst [vmem:[#allocation22_spill] sm:$0xff] %v1647_v53  ;;  %v290_v32 = vadd.f32 %v1483_v0, %v288_v15  ;;  %v316_v56 = vadd.f32 %v1507_v51, %v314_v45  ;;  %v410_v1 = vmax.f32 %v1553_v17, %v1562_v39  ;;  %v411_v2 = vmax.f32 %v1556_v37, %v1565_v40 }
  0x4f   : > { %v412_v59 = vmax.f32 %v1562_v39, %v1571_v28  ;;  %v413_v23 = vmax.f32 %v1565_v40, %v1574_v8  ;;  %v414_v21 = vmax.f32 %v1571_v28, %v1577_v61  ;;  %v415_v0 = vmax.f32 %v1574_v8, %v1580_v49 }
  0x50   : > { %v292_v51 = vadd.f32 %v1486_v22, %v290_v32  ;;  %v318_v4 = vadd.f32 %v1511_v54, %v316_v56  ;;  %v416_v9 = vmax.f32 %v1577_v61, %v1587_v57  ;;  %v417_v5 = vmax.f32 %v1580_v49, %v1590_v58  ;;  %v2410_v32 = vld [vmem:[#allocation13_spill] sm:$0xff] }
  0x51   : > { %v418_v27 = vmax.f32 %v1587_v57, %v1596_v3  ;;  %v419_v24 = vmax.f32 %v1590_v58, %v1599_v34  ;;  %v420_v13 = vmax.f32 %v1596_v3, %v1602_v10  ;;  %v421_v22 = vmax.f32 %v1599_v34, %v1605_v7 }
  0x52   : > { %v294_v54 = vadd.f32 %v2408_v18, %v292_v51  ;;  %v320_v43 = vadd.f32 %v2409_v42, %v318_v4  ;;  %v422_v19 = vmax.f32 %v1602_v10, %v1612_v29  ;;  %v423_v38 = vmax.f32 %v1605_v7, %v1615_v11 }
  0x53   : > { %v424_v20 = vmax.f32 %v1612_v29, %v1618_v12  ;;  %v425_v47 = vmax.f32 %v1615_v11, %v1621_v30  ;;  %v426_v15 = vmax.f32 %v1618_v12, %v1624_v60  ;;  %v427_v45 = vmax.f32 %v1621_v30, %v1627_v31 }
  0x54   : > { %v322_v56 = vadd.f32 %v2410_v32, %v320_v43  ;;  %v428_v51 = vmax.f32 %v1624_v60, %v1632_v46  ;;  %v429_v4 = vmax.f32 %v1627_v31, %v1635_v52  ;;  %v430_v18 = vmax.f32 %v1632_v46, %v1638_v25  ;;  %v2411_v43 = vld [vmem:[#allocation14_spill] sm:$0xff] }
  0x55   : > { %v325_v42 = vsel %vm265_vm0, %v294_v54, 0.0  ;;  %v431_v33 = vmax.f32 %v1635_v52, %v1641_v55  ;;  %v432_v6 = vmax.f32 %v404_v50, %v1547_v14  ;;  %v433_v16 = vmax.f32 %v405_v36, %v1550_v35 }
  0x56   : > { %v324_v32 = vadd.f32 %v2411_v43, %v322_v56  ;;  %v434_v26 = vmax.f32 %v406_v41, %v1553_v17  ;;  %v435_v53 = vmax.f32 %v407_v63, %v1556_v37  ;;  %v436_v48 = vmax.f32 %v408_v44, %v1562_v39 }
  0x57   : > { %v437_v25 = vmax.f32 %v409_v62, %v1565_v40  ;;  %v438_v54 = vmax.f32 %v410_v1, %v1571_v28  ;;  %v439_v46 = vmax.f32 %v411_v2, %v1574_v8  ;;  %v440_v55 = vmax.f32 %v412_v59, %v1577_v61 }
  0x58   : > { %v326_v50 = vsel %vm295_vm1, %v324_v32, 0.0  ;;  %v441_v36 = vmax.f32 %v413_v23, %v1580_v49  ;;  %v442_v56 = vmax.f32 %v414_v21, %v1587_v57  ;;  %v443_v41 = vmax.f32 %v415_v0, %v1590_v58 }
  0x59   : > { %v327_v43 = vadd.f32 %v326_v50, %v325_v42  ;;  %v444_v63 = vmax.f32 %v416_v9, %v1596_v3  ;;  %v445_v44 = vmax.f32 %v417_v5, %v1599_v34  ;;  %v446_v62 = vmax.f32 %v418_v27, %v1602_v10  ;;  %v2412_v9 = vld [vmem:[#allocation7_spill] sm:$0xff] }
  0x5a   : > { %v447_v1 = vmax.f32 %v419_v24, %v1605_v7  ;;  %v448_v2 = vmax.f32 %v420_v13, %v1612_v29  ;;  %v449_v59 = vmax.f32 %v421_v22, %v1615_v11  ;;  %v450_v32 = vmax.f32 %v422_v19, %v1618_v12  ;;  %v2413_v11 = vld [vmem:[#allocation8_spill] sm:$0xff]  ;;  %v2414_v29 = vld [vmem:[#allocation9_spill] sm:$0xff] }
  0x5b   : > { %v328_v23 = vrot.slane %v327_v43, 4  ;;  %v451_v21 = vmax.f32 %v423_v38, %v1621_v30  ;;  %v452_v0 = vmax.f32 %v424_v20, %v1624_v60  ;;  %v453_v42 = vmax.f32 %v425_v47, %v1627_v31  ;;  %v2415_v30 = vld [vmem:[#allocation10_spill] sm:$0xff] }
  0x5c   : > { %v454_v50 = vmax.f32 %v426_v15, %v2412_v9  ;;  %v460_v5 = vsel %vm265_vm0, %v432_v6, 0.0  ;;  %v461_v27 = vsel %vm265_vm0, %v434_v26, 0.0  ;;  %v463_v24 = vsel %vm265_vm0, %v436_v48, 0.0  ;;  %v2416_v60 = vld [vmem:[#allocation22_spill] sm:$0xff] }
  0x5d   : > { %v329_v13 = vadd.f32 %v328_v23, %v327_v43  ;;  %v455_v22 = vmax.f32 %v427_v45, %v1635_v52  ;;  %v456_v19 = vmax.f32 %v428_v51, %v2413_v11  ;;  %v462_v12 = vadd.f32 %v461_v27, %v460_v5  ;;  %v530_v5 = vld [vmem:[%s1263_s24 + $0xb] sm:$0x1f] }
  0x5e   : > { %v457_v38 = vmax.f32 %v429_v4, %v2414_v29  ;;  %v458_v20 = vmax.f32 %v430_v18, %v2415_v30  ;;  %v459_v47 = vmax.f32 %v431_v33, %v2416_v60  ;;  %v465_v15 = vsel %vm265_vm0, %v438_v54, 0.0 }
  0x5f   : > { %v330_v9 = vrot.slane %v329_v13, 2  ;;  %v464_v6 = vadd.f32 %v463_v24, %v462_v12  ;;  %v467_v26 = vsel %vm265_vm0, %v440_v55, 0.0  ;;  %v469_v48 = vsel %vm265_vm0, %v442_v56, 0.0 }
  0x60   : > { %v471_v43 = vsel %vm265_vm0, %v444_v63, 0.0  ;;  %v473_v45 = vsel %vm265_vm0, %v446_v62, 0.0  ;;  %v475_v51 = vsel %vm265_vm0, %v448_v2, 0.0  ;;  %v488_v4 = vsel %vm487_vm2, %v433_v16, 0.0 }
  0x61   : > { %v331_v23 = vadd.f32 %v330_v9, %v329_v13  ;;  %v466_v18 = vadd.f32 %v465_v15, %v464_v6  ;;  %v489_v33 = vsel %vm487_vm2, %v435_v53, 0.0  ;;  %v491_v12 = vsel %vm487_vm2, %v437_v25, 0.0  ;;  %v533_v6 = vld [vmem:[%s1263_s24 + $0x23] sm:$0xff] }
  0x62   : > { %v1758_v55 = vsel %vm265_vm0, %v450_v32, 0.0  ;;  %v1761_v54 = vsel %vm265_vm0, %v452_v0, 0.0  ;;  %v1764_v56 = vsel %vm265_vm0, %v454_v50, 0.0  ;;  %v490_v63 = vadd.f32 %v489_v33, %v488_v4  ;;  %v529_v50 = vld [vmem:[%s1263_s24 + $0x3] sm:$0xff]  ;;  %v538_v33 = vld [vmem:[%s1263_s24 + $0x4b] sm:$0x1f] }
  0x63   : > { %v332_v16 = vrot.slane %v331_v23, 1  ;;  %v468_v62 = vadd.f32 %v467_v26, %v466_v18  ;;  %v1767_v2 = vsel %vm265_vm0, %v456_v19, 0.0  ;;  %v493_v53 = vsel %vm487_vm2, %v439_v46, 0.0  ;;  %v531_v19 = vld [vmem:[%s1263_s24 + $0x13] sm:$0xff]  ;;  %v537_v18 = vld [vmem:[%s1263_s24 + $0x43] sm:$0xff] }
  0x64   : > { %v1771_v25 = vsel %vm265_vm0, %v458_v20, 0.0  ;;  %v492_v32 = vadd.f32 %v491_v12, %v490_v63  ;;  %v495_v0 = vsel %vm487_vm2, %v441_v36, 0.0  ;;  %v497_v9 = vsel %vm487_vm2, %v443_v41, 0.0  ;;  %v532_v20 = vld [vmem:[%s1263_s24 + $0x1b] sm:$0x1f]  ;;  %v535_v26 = vld [vmem:[%s1263_s24 + $0x33] sm:$0xff] }
  0x65   : > { %v470_v27 = vadd.f32 %v469_v48, %v468_v62  ;;  %v499_v24 = vsel %vm487_vm2, %v445_v44, 0.0  ;;  %v501_v13 = vsel %vm487_vm2, %v447_v1, 0.0  ;;  %v1780_v46 = vsel %vm487_vm2, %v449_v59, 0.0  ;;  %v534_v1 = vld [vmem:[%s1263_s24 + $0x2b] sm:$0x1f]  ;;  %v539_v12 = vld [vmem:[%s1263_s24 + $0x53] sm:$0xff] }
  0x66   : > { %v1784_v36 = vadd.f32 %v332_v16, %v331_v23  ;;  %v494_v41 = vadd.f32 %v493_v53, %v492_v32  ;;  %v1787_v15 = vsel %vm487_vm2, %v451_v21, 0.0  ;;  %v1790_v44 = vsel %vm487_vm2, %v453_v42, 0.0  ;;  %v536_v21 = vld [vmem:[%s1263_s24 + $0x3b] sm:$0x1f]  ;;  %v541_v32 = vld [vmem:[%s1263_s24 + $0x63] sm:$0xff] }
  0x67   : > { %v472_v59 = vadd.f32 %v471_v43, %v470_v27  ;;  %v1796_v48 = vsel %vm487_vm2, %v455_v22, 0.0  ;;  %v1799_v4 = vsel %vm487_vm2, %v457_v38, 0.0  ;;  %v1802_v23 = vsel %vm487_vm2, %v459_v47, 0.0  ;;  %v540_v63 = vld [vmem:[%s1263_s24 + $0x5b] sm:$0x1f]  ;;  %v2419_v43 = vld [vmem:[#allocation15_spill] sm:$0xff] }
  0x68   : > { %2417 = vst [vmem:[#allocation11_spill] sm:$0xff] %v1784_v36  ;;  %2418 = vst [vmem:[#allocation12_spill] sm:$0xff] %v1802_v23  ;;  %v496_v42 = vadd.f32 %v495_v0, %v494_v41  ;;  %v1810_v16 = vmax.f32 %v2419_v43, %v529_v50  ;;  %v2420_v22 = vld [vmem:[#allocation16_spill] sm:$0xff]  ;;  %v2421_v38 = vld [vmem:[#allocation17_spill] sm:$0xff]  ;;  %v1825_v23 = vmax.f32 %v1547_v14, %v533_v6 }
  0x69   : > { %v1813_v62 = vmax.f32 %v2420_v22, %v530_v5  ;;  %v1816_v53 = vmax.f32 %v2421_v38, %v531_v19  ;;  %v474_v47 = vadd.f32 %v473_v45, %v472_v59  ;;  %v542_v0 = vld [vmem:[%s1263_s24 + $0x6b] sm:$0x1f]  ;;  %v543_v27 = vld [vmem:[%s1263_s24 + $0x73] sm:$0xff]  ;;  %v1828_v50 = vmax.f32 %v1550_v35, %v534_v1  ;;  %v544_v19 = vld [vmem:[%s1263_s24 + $0x7b] sm:$0x1f] }
  0x6a   : > { %v2422_v41 = vld [vmem:[#allocation18_spill] sm:$0xff]  ;;  %v498_v5 = vadd.f32 %v497_v9, %v496_v42  ;;  %v1834_v43 = vmax.f32 %v1553_v17, %v535_v26  ;;  %v1837_v22 = vmax.f32 %v1556_v37, %v536_v21  ;;  %v547_v35 = vld [vmem:[%s1263_s24 + $0x93] sm:$0xff]  ;;  %v548_v9 = vld [vmem:[%s1263_s24 + $0x9b] sm:$0x1f]  ;;  %v1846_v1 = vmax.f32 %v1565_v40, %v538_v33 }
  0x6b   : > { %v1822_v36 = vmax.f32 %v2422_v41, %v532_v20  ;;  %v545_v45 = vld [vmem:[%s1263_s24 + $0x83] sm:$0xff]  ;;  %v546_v59 = vld [vmem:[%s1263_s24 + $0x8b] sm:$0x1f]  ;;  %v1840_v20 = vmax.f32 %v1562_v39, %v537_v18  ;;  %v476_v14 = vadd.f32 %v475_v51, %v474_v47  ;;  %v1849_v42 = vmax.f32 %v1571_v28, %v539_v12  ;;  %v551_v51 = vld [vmem:[%s1263_s24 + $0xb3] sm:$0xff] }
  0x6c   : > { %v549_v6 = vld [vmem:[%s1263_s24 + $0xa3] sm:$0xff]  ;;  %v1852_v17 = vmax.f32 %v1574_v8, %v540_v63  ;;  %v500_v37 = vadd.f32 %v499_v24, %v498_v5  ;;  %v550_v39 = vld [vmem:[%s1263_s24 + $0xab] sm:$0x1f]  ;;  %v552_v26 = vld [vmem:[%s1263_s24 + $0xbb] sm:$0x1f]  ;;  %v1858_v21 = vmax.f32 %v1577_v61, %v541_v32  ;;  %v1861_v18 = vmax.f32 %v1580_v49, %v542_v0 }
  0x6d   : > { %v1864_v40 = vmax.f32 %v1587_v57, %v543_v27  ;;  %v478_v28 = vadd.f32 %v1758_v55, %v476_v14  ;;  %v553_v8 = vld [vmem:[%s1263_s24 + $0xc3] sm:$0xff]  ;;  %v554_v33 = vld [vmem:[%s1263_s24 + $0xcb] sm:$0x1f]  ;;  %v555_v12 = vld [vmem:[%s1263_s24 + $0xd3] sm:$0xff]  ;;  %v1871_v24 = vmax.f32 %v1590_v58, %v544_v19  ;;  %v1874_v63 = vmax.f32 %v1596_v3, %v545_v45 }
  0x6e   : > { %v1877_v61 = vmax.f32 %v1599_v34, %v546_v59  ;;  %v502_v38 = vadd.f32 %v501_v13, %v500_v37  ;;  %v556_v49 = vld [vmem:[%s1263_s24 + $0xdb] sm:$0x1f]  ;;  %v557_v47 = vld [vmem:[%s1263_s24 + $0xe3] sm:$0xff]  ;;  %v558_v32 = vld [vmem:[%s1263_s24 + $0xeb] sm:$0x1f]  ;;  %v1883_v57 = vmax.f32 %v1602_v10, %v547_v35  ;;  %v1886_v55 = vmax.f32 %v1605_v7, %v548_v9 }
  0x6f   : > { %v2423_v0 = vld [vmem:[#allocation19_spill] sm:$0xff]  ;;  %v480_v58 = vadd.f32 %v1761_v54, %v478_v28  ;;  %v2424_v3 = vld [vmem:[#allocation20_spill] sm:$0xff]  ;;  %v2425_v34 = vld [vmem:[#allocation21_spill] sm:$0xff]  ;;  %v1906_v59 = vmax.f32 %v1627_v31, %v554_v33  ;;  %v1913_v9 = vmax.f32 %v1635_v52, %v556_v49  ;;  %v593_v31 = vmax.f32 %v1810_v16, %v1816_v53 }
  0x70   : > { %v1889_v27 = vmax.f32 %v2423_v0, %v549_v6  ;;  %v1893_v41 = vmax.f32 %v2424_v3, %v550_v39  ;;  %v1896_v13 = vmax.f32 %v2425_v34, %v551_v51  ;;  %v2426_v5 = vld [vmem:[#allocation5_spill] sm:$0xff]  ;;  %v504_v10 = vadd.f32 %v1780_v46, %v502_v38  ;;  %v2427_v45 = vld [vmem:[#allocation6_spill] sm:$0xff]  ;;  %v2428_v14 = vld [vmem:[#allocation7_spill] sm:$0xff] }
  0x71   : > { %v1899_v19 = vmax.f32 %v2426_v5, %v552_v26  ;;  %v1903_v7 = vmax.f32 %v2427_v45, %v553_v8  ;;  %v1909_v54 = vmax.f32 %v2428_v14, %v555_v12  ;;  %v482_v35 = vadd.f32 %v1764_v56, %v480_v58  ;;  %v1930_v51 = vld [vmem:[%s1263_s24 + $0xf3] sm:$0xff]  ;;  %v1940_v28 = vld [vmem:[%s1263_s24 + $0xfb] sm:$0x1f] }
  0x72   : > { %v1916_v6 = vmax.f32 %v2413_v11, %v557_v47  ;;  %v1919_v46 = vmax.f32 %v2414_v29, %v558_v32  ;;  %v506_v37 = vadd.f32 %v1787_v15, %v504_v10  ;;  %v594_v39 = vmax.f32 %v1813_v62, %v1822_v36 }
  0x73   : > { %v599_v56 = vmax.f32 %v1825_v23, %v1834_v43  ;;  %v484_v52 = vadd.f32 %v1767_v2, %v482_v35  ;;  %v600_v11 = vmax.f32 %v1828_v50, %v1837_v22  ;;  %v607_v29 = vmax.f32 %v1840_v20, %v1849_v42 }
  0x74   : > { %v608_v15 = vmax.f32 %v1846_v1, %v1852_v17  ;;  %v508_v26 = vadd.f32 %v1790_v44, %v506_v37  ;;  %v595_v8 = vmax.f32 %v593_v31, %v1825_v23  ;;  %v596_v33 = vmax.f32 %v594_v39, %v1828_v50  ;;  %v2429_v31 = vld [vmem:[#allocation12_spill] sm:$0xff] }
  0x75   : > { %v601_v2 = vmax.f32 %v599_v56, %v1840_v20  ;;  %v486_v12 = vadd.f32 %v1771_v25, %v484_v52  ;;  %v602_v38 = vmax.f32 %v600_v11, %v1846_v1  ;;  %v609_v49 = vmax.f32 %v607_v29, %v1858_v21 }
  0x76   : > { %v610_v47 = vmax.f32 %v608_v15, %v1861_v18  ;;  %v510_v32 = vadd.f32 %v1796_v48, %v508_v26  ;;  %v591_v44 = vmax.f32 %v2415_v30, %v1930_v51  ;;  %v597_v0 = vmax.f32 %v595_v8, %v1834_v43 }
  0x77   : > { %v598_v58 = vmax.f32 %v596_v33, %v1837_v22  ;;  %v592_v3 = vmax.f32 %v2416_v60, %v1940_v28  ;;  %v603_v25 = vmax.f32 %v601_v2, %v1849_v42  ;;  %v604_v34 = vmax.f32 %v602_v38, %v1852_v17 }
  0x78   : > { %v611_v5 = vmax.f32 %v609_v49, %v1864_v40  ;;  %v512_v10 = vadd.f32 %v1799_v4, %v510_v32  ;;  %v515_v48 = vsel %vm265_vm0, %v486_v12, 0.0  ;;  %v612_v45 = vmax.f32 %v610_v47, %v1871_v24 }
  0x79   : > { %v615_v30 = vmax.f32 %v1858_v21, %v1864_v40  ;;  %v605_v14 = vadd.f32 %v603_v25, %v597_v0  ;;  %v606_v35 = vadd.f32 %v604_v34, %v598_v58  ;;  %v616_v60 = vmax.f32 %v1861_v18, %v1871_v24 }
  0x7a   : > { %v623_v37 = vmax.f32 %v1874_v63, %v1883_v57  ;;  %v514_v39 = vadd.f32 %v2429_v31, %v512_v10  ;;  %v624_v4 = vmax.f32 %v1877_v61, %v1886_v55  ;;  %v631_v52 = vmax.f32 %v1889_v27, %v1896_v13 }
  0x7b   : > { %v617_v56 = vmax.f32 %v615_v30, %v1874_v63  ;;  %v613_v51 = vadd.f32 %v611_v5, %v605_v14  ;;  %v614_v11 = vadd.f32 %v612_v45, %v606_v35  ;;  %v618_v29 = vmax.f32 %v616_v60, %v1877_v61 }
  0x7c   : > { %v625_v15 = vmax.f32 %v623_v37, %v1889_v27  ;;  %v516_v26 = vsel %vm487_vm2, %v514_v39, 0.0  ;;  %v626_v8 = vmax.f32 %v624_v4, %v1893_v41  ;;  %v632_v33 = vmax.f32 %v1893_v41, %v1899_v19  ;;  %v670_v39 = vld [vmem:[%s1263_s24 + $0x4] sm:$0xff] }
  0x7d   : > { %v619_v28 = vmax.f32 %v617_v56, %v1883_v57  ;;  %v517_v2 = vadd.f32 %v516_v26, %v515_v48  ;;  %v620_v12 = vmax.f32 %v618_v29, %v1886_v55  ;;  %v633_v49 = vmax.f32 %v631_v52, %v1903_v7  ;;  %v2430_v48 = vld [vmem:[#allocation11_spill] sm:$0xff]  ;;  %v671_v52 = vld [vmem:[%s1263_s24 + $0xc] sm:$0xf]  ;;  %v673_v26 = vld [vmem:[%s1263_s24 + $0x1c] sm:$0xf] }
  0x7e   : > { %v627_v38 = vmax.f32 %v625_v15, %v1896_v13  ;;  %v628_v32 = vmax.f32 %v626_v8, %v1899_v19  ;;  %v634_v0 = vmax.f32 %v632_v33, %v1906_v59  ;;  %v639_v58 = vmax.f32 %v1903_v7, %v1909_v54 }
  0x7f   : > { %v621_v47 = vadd.f32 %v619_v28, %v613_v51  ;;  %v518_v25 = vrot.slane %v517_v2, 4  ;;  %v622_v34 = vadd.f32 %v620_v12, %v614_v11  ;;  %v635_v5 = vmax.f32 %v633_v49, %v1909_v54  ;;  %v672_v51 = vld [vmem:[%s1263_s24 + $0x14] sm:$0xff]  ;;  %v674_v28 = vld [vmem:[%s1263_s24 + $0x24] sm:$0xff] }
  0x80   : > { %v640_v10 = vmax.f32 %v1906_v59, %v1913_v9  ;;  %v334_v45 = vmax.f32 %v2430_v48, 0.0  ;;  %v636_v14 = vmax.f32 %v634_v0, %v1913_v9  ;;  %v641_v35 = vmax.f32 %v639_v58, %v1916_v6  ;;  %v676_v12 = vld [vmem:[%s1263_s24 + $0x34] sm:$0xff] }
  0x81   : > { %v629_v30 = vadd.f32 %v627_v38, %v621_v47  ;;  %v519_v60 = vadd.f32 %v518_v25, %v517_v2  ;;  %v630_v37 = vadd.f32 %v628_v32, %v622_v34  ;;  %v675_v2 = vld [vmem:[%s1263_s24 + $0x2c] sm:$0xf]  ;;  %v677_v38 = vld [vmem:[%s1263_s24 + $0x3c] sm:$0xf]  ;;  %v2013_v0 = vmax.f32 %v1813_v62, %v671_v52  ;;  %v688_v52 = vld [vmem:[%s1263_s24 + $0x94] sm:$0xff] }
  0x82   : > { %v642_v31 = vmax.f32 %v640_v10, %v1919_v46  ;;  %v643_v4 = vmax.f32 %v641_v35, %v591_v44  ;;  %v2000_v8 = vadd.f32 1.0, %v334_v45  ;;  %v2006_v44 = vmax.f32 %v1810_v16, %v670_v39  ;;  %v679_v32 = vld [vmem:[%s1263_s24 + $0x4c] sm:$0xf]  ;;  %v681_v16 = vld [vmem:[%s1263_s24 + $0x5c] sm:$0xf] }
  0x83   : > { %v637_v56 = vadd.f32 %v635_v5, %v629_v30  ;;  %v520_v11 = vrot.slane %v519_v60, 2  ;;  %v638_v29 = vadd.f32 %v636_v14, %v630_v37  ;;  %v2016_v58 = vmax.f32 %v1816_v53, %v672_v51  ;;  %v680_v5 = vld [vmem:[%s1263_s24 + $0x54] sm:$0xff]  ;;  %v682_v30 = vld [vmem:[%s1263_s24 + $0x64] sm:$0xff]  ;;  %v683_v62 = vld [vmem:[%s1263_s24 + $0x6c] sm:$0xf] }
  0x84   : > { %v644_v15 = vmax.f32 %v642_v31, %v592_v3  ;;  %v678_v3 = vld [vmem:[%s1263_s24 + $0x44] sm:$0xff]  ;;  %v2021_v10 = vmax.f32 %v1822_v36, %v673_v26  ;;  %v2024_v48 = vmax.f32 %v1825_v23, %v674_v28  ;;  %v684_v53 = vld [vmem:[%s1263_s24 + $0x74] sm:$0xff]  ;;  %v2030_v14 = vmax.f32 %v1828_v50, %v675_v2  ;;  %v685_v37 = vld [vmem:[%s1263_s24 + $0x7c] sm:$0xf] }
  0x85   : > { %v645_v33 = vadd.f32 %v643_v4, %v637_v56  ;;  %v521_v49 = vadd.f32 %v520_v11, %v519_v60  ;;  %v2033_v35 = vmax.f32 %v1834_v43, %v676_v12  ;;  %v2036_v60 = vmax.f32 %v1837_v22, %v677_v38  ;;  %v686_v31 = vld [vmem:[%s1263_s24 + $0x84] sm:$0xff]  ;;  %v687_v39 = vld [vmem:[%s1263_s24 + $0x8c] sm:$0xf]  ;;  %v689_v51 = vld [vmem:[%s1263_s24 + $0x9c] sm:$0xf] }
  0x86   : > { %v2008_v47 = vadd.f32 %v644_v15, %v638_v29  ;;  %v2042_v56 = vmax.f32 %v1840_v20, %v678_v3  ;;  %v2045_v50 = vmax.f32 %v1846_v1, %v679_v32  ;;  %v690_v11 = vld [vmem:[%s1263_s24 + $0xa4] sm:$0xff]  ;;  %v2055_v29 = vmax.f32 %v1849_v42, %v680_v5  ;;  %v691_v20 = vld [vmem:[%s1263_s24 + $0xac] sm:$0xf]  ;;  %v692_v26 = vld [vmem:[%s1263_s24 + $0xb4] sm:$0xff] }
  0x87   : > { %v648_v25 = vrot.slane %v645_v33, 2  ;;  %v651_v34 = vrot.slane %v645_v33, 4  ;;  %v522_v45 = vrot.slane %v521_v49, 1  ;;  %v654_v23 = vrot.slane %v645_v33, 6  ;;  %v693_v28 = vld [vmem:[%s1263_s24 + $0xbc] sm:$0xf] }
  0x88   : > { %v659_v22 = vrot.slane %v2008_v47, 2  ;;  %v662_v4 = vrot.slane %v2008_v47, 4  ;;  %v2061_v1 = vmax.f32 %v1852_v17, %v681_v16  ;;  %v2067_v2 = vmax.f32 %v1861_v18, %v683_v62  ;;  %v694_v12 = vld [vmem:[%s1263_s24 + $0xc4] sm:$0xff] }
  0x89   : > { %v650_v36 = vadd.f32 %v648_v25, %v645_v33  ;;  %v2047_v43 = vadd.f32 %v522_v45, %v521_v49  ;;  %v2064_v33 = vmax.f32 %v1858_v21, %v682_v30  ;;  %v2071_v38 = vmax.f32 %v1864_v40, %v684_v53  ;;  %v695_v21 = vld [vmem:[%s1263_s24 + $0xcc] sm:$0xf]  ;;  %v696_v25 = vld [vmem:[%s1263_s24 + $0xd4] sm:$0xff] }
  0x8a   : > { %v2074_v42 = vmax.f32 %v1871_v24, %v685_v37  ;;  %v2077_v49 = vmax.f32 %v1874_v63, %v686_v31  ;;  %v2080_v3 = vmax.f32 %v1877_v61, %v687_v39  ;;  %v2085_v32 = vmax.f32 %v1883_v57, %v688_v52 }
  0x8b   : > { %v653_v15 = vadd.f32 %v651_v34, %v650_v36  ;;  %v524_v17 = vmax.f32 %v2047_v43, 0.0  ;;  %v2088_v18 = vmax.f32 %v1886_v55, %v689_v51  ;;  %v2091_v40 = vmax.f32 %v1889_v27, %v690_v11  ;;  %v815_v43 = vld [vmem:[%s1263_s24 + $0x3d] sm:$0x7] }
  0x8c   : > { %v2095_v63 = vmax.f32 %v1893_v41, %v691_v20  ;;  %v2098_v61 = vmax.f32 %v1896_v13, %v692_v26  ;;  %v2101_v34 = vmax.f32 %v1899_v19, %v693_v28  ;;  %v2104_v57 = vmax.f32 %v1903_v7, %v694_v12 }
  0x8d   : > { %v656_v24 = vadd.f32 %v654_v23, %v653_v15  ;;  %v730_v55 = vmax.f32 %v2006_v44, %v2016_v58  ;;  %v731_v27 = vmax.f32 %v2013_v0, %v2021_v10  ;;  %v738_v5 = vmax.f32 %v2024_v48, %v2033_v35 }
  0x8e   : > { %v2113_v41 = vmax.f32 %v1906_v59, %v695_v21  ;;  %v739_v13 = vmax.f32 %v2030_v14, %v2036_v60  ;;  %v748_v19 = vmax.f32 %v2042_v56, %v2055_v29  ;;  %v749_v7 = vmax.f32 %v2045_v50, %v2061_v1  ;;  %v697_v59 = vld [vmem:[%s1263_s24 + $0xdc] sm:$0xf] }
  0x8f   : > { %v2122_v16 = vmax.f32 %v1909_v54, %v696_v25  ;;  %v732_v45 = vmax.f32 %v730_v55, %v2024_v48  ;;  %v733_v30 = vmax.f32 %v731_v27, %v2030_v14  ;;  %v740_v62 = vmax.f32 %v738_v5, %v2042_v56 }
  0x90   : > { %v741_v53 = vmax.f32 %v739_v13, %v2045_v50  ;;  %v750_v36 = vmax.f32 %v748_v19, %v2064_v33  ;;  %v751_v23 = vmax.f32 %v749_v7, %v2067_v2  ;;  %v758_v37 = vmax.f32 %v2064_v33, %v2071_v38 }
  0x91   : > { %v657_v54 = vadd.f32 %v656_v24, %v2008_v47  ;;  %v734_v31 = vmax.f32 %v732_v45, %v2033_v35  ;;  %v735_v39 = vmax.f32 %v733_v30, %v2036_v60  ;;  %v742_v52 = vmax.f32 %v740_v62, %v2055_v29  ;;  %v698_v24 = vld [vmem:[%s1263_s24 + $0xe4] sm:$0xff]  ;;  %v699_v45 = vld [vmem:[%s1263_s24 + $0xec] sm:$0xf] }
  0x92   : > { %v743_v51 = vmax.f32 %v741_v53, %v2061_v1  ;;  %v752_v11 = vmax.f32 %v750_v36, %v2071_v38  ;;  %v753_v15 = vmax.f32 %v751_v23, %v2074_v42  ;;  %v759_v20 = vmax.f32 %v2067_v2, %v2074_v42 }
  0x93   : > { %v2143_v26 = vmax.f32 %v1913_v9, %v697_v59  ;;  %v736_v28 = vmax.f32 %v734_v31, %v2042_v56  ;;  %v737_v12 = vmax.f32 %v735_v39, %v2045_v50  ;;  %v744_v21 = vmax.f32 %v742_v52, %v2064_v33 }
  0x94   : > { %v745_v25 = vmax.f32 %v743_v51, %v2067_v2  ;;  %v754_v55 = vmax.f32 %v752_v11, %v2077_v49  ;;  %v755_v27 = vmax.f32 %v753_v15, %v2080_v3  ;;  %v760_v5 = vmax.f32 %v758_v37, %v2077_v49 }
  0x95   : > { %v661_v13 = vadd.f32 %v659_v22, %v657_v54  ;;  %v746_v19 = vadd.f32 %v744_v21, %v736_v28  ;;  %v761_v9 = vmax.f32 %v759_v20, %v2080_v3  ;;  %v768_v7 = vmax.f32 %v2077_v49, %v2085_v32 }
  0x96   : > { %v747_v30 = vadd.f32 %v745_v25, %v737_v12  ;;  %v762_v62 = vmax.f32 %v760_v5, %v2085_v32  ;;  %v769_v59 = vmax.f32 %v2080_v3, %v2088_v18  ;;  %v778_v53 = vmax.f32 %v2091_v40, %v2098_v61  ;;  %v2194_v5 = vld [vmem:[%s1263_s24 + $0x15] sm:$0xff] }
  0x97   : > { %v2163_v36 = vmax.f32 %v1916_v6, %v698_v24  ;;  %v756_v22 = vadd.f32 %v754_v55, %v746_v19  ;;  %v763_v23 = vmax.f32 %v761_v9, %v2088_v18  ;;  %v770_v37 = vmax.f32 %v768_v7, %v2091_v40  ;;  %v2186_v55 = vld [vmem:[%s1263_s24 + $0x5] sm:$0xff] }
  0x98   : > { %v757_v54 = vadd.f32 %v755_v27, %v747_v30  ;;  %v764_v31 = vmax.f32 %v762_v62, %v2091_v40  ;;  %v771_v39 = vmax.f32 %v769_v59, %v2095_v63  ;;  %v779_v52 = vmax.f32 %v2095_v63, %v2101_v34  ;;  %v2191_v27 = vld [vmem:[%s1263_s24 + $0xd] sm:$0x7]  ;;  %v814_v62 = vld [vmem:[%s1263_s24 + $0x35] sm:$0xff] }
  0x99   : > { %v2172_v51 = vmax.f32 %v1919_v46, %v699_v45  ;;  %v765_v6 = vmax.f32 %v763_v23, %v2095_v63  ;;  %v772_v11 = vmax.f32 %v770_v37, %v2098_v61  ;;  %v780_v15 = vmax.f32 %v778_v53, %v2104_v57  ;;  %v2206_v45 = vld [vmem:[%s1263_s24 + $0x25] sm:$0xff]  ;;  %v2209_v30 = vld [vmem:[%s1263_s24 + $0x2d] sm:$0x7] }
  0x9a   : > { %v2179_v20 = vadd.f32 %v662_v4, %v661_v13  ;;  %v766_v28 = vadd.f32 %v764_v31, %v756_v22  ;;  %v773_v12 = vmax.f32 %v771_v39, %v2101_v34  ;;  %v781_v21 = vmax.f32 %v779_v52, %v2113_v41  ;;  %v2197_v13 = vld [vmem:[%s1263_s24 + $0x1d] sm:$0x7]  ;;  %v817_v22 = vld [vmem:[%s1263_s24 + $0x4d] sm:$0x7]  ;;  %v820_v39 = vld [vmem:[%s1263_s24 + $0x65] sm:$0xff] }
  0x9b   : > { %v767_v46 = vadd.f32 %v765_v6, %v757_v54  ;;  %v774_v24 = vmax.f32 %v772_v11, %v2104_v57  ;;  %v782_v25 = vmax.f32 %v780_v15, %v2122_v16  ;;  %1102 = vlog2.f32 %v2000_v8  ;;  %v818_v54 = vld [vmem:[%s1263_s24 + $0x55] sm:$0xff]  ;;  %v819_v31 = vld [vmem:[%s1263_s24 + $0x5d] sm:$0x7] }
  0x9c   : > { %v775_v47 = vmax.f32 %v773_v12, %v2113_v41  ;;  %v783_v4 = vmax.f32 %v781_v21, %v2143_v26  ;;  %v2202_v19 = vadd.f32 1.0, %v524_v17  ;;  %v665_v59 = vmax.f32 %v2179_v20, 0.0  ;;  %v816_v17 = vld [vmem:[%s1263_s24 + $0x45] sm:$0xff]  ;;  %v823_v12 = vld [vmem:[%s1263_s24 + $0x7d] sm:$0x7] }
  0x9d   : > { %v776_v9 = vadd.f32 %v774_v24, %v766_v28  ;;  %v784_v7 = vmax.f32 %v782_v25, %v2163_v36  ;;  %v838_v23 = vmax.f32 %v2006_v44, %v2186_v55  ;;  %v839_v52 = vmax.f32 %v2013_v0, %v2191_v27  ;;  %v821_v44 = vld [vmem:[%s1263_s24 + $0x6d] sm:$0x7]  ;;  %v822_v28 = vld [vmem:[%s1263_s24 + $0x75] sm:$0xff]  ;;  %v828_v27 = vld [vmem:[%s1263_s24 + $0xa5] sm:$0xff] }
  0x9e   : > { %v777_v53 = vadd.f32 %v775_v47, %v767_v46  ;;  %v785_v8 = vmax.f32 %v783_v4, %v2172_v51  ;;  %v840_v6 = vmax.f32 %v2016_v58, %v2194_v5  ;;  %v841_v11 = vmax.f32 %v2021_v10, %v2197_v13  ;;  %v824_v10 = vld [vmem:[%s1263_s24 + $0x85] sm:$0xff]  ;;  %v825_v25 = vld [vmem:[%s1263_s24 + $0x8d] sm:$0x7]  ;;  %v826_v55 = vld [vmem:[%s1263_s24 + $0x95] sm:$0xff] }
  0x9f   : > { %v786_v37 = vadd.f32 %v784_v7, %v776_v9  ;;  %v842_v21 = vmax.f32 %v2024_v48, %v2206_v45  ;;  %v843_v0 = vmax.f32 %v2030_v14, %v2209_v30  ;;  %v2238_v46 = vmax.f32 %v2033_v35, %v814_v62  ;;  %v827_v48 = vld [vmem:[%s1263_s24 + $0x9d] sm:$0x7]  ;;  %v829_v5 = vld [vmem:[%s1263_s24 + $0xad] sm:$0x7]  ;;  %v830_v30 = vld [vmem:[%s1263_s24 + $0xb5] sm:$0xff] }
  0xa0   : > { %v2228_v15 = vadd.f32 %v785_v8, %v777_v53  ;;  %v845_v47 = vmax.f32 %v2036_v60, %v815_v43  ;;  %v846_v4 = vmax.f32 %v2042_v56, %v816_v17  ;;  %v847_v14 = vmax.f32 %v2045_v50, %v817_v22  ;;  %v831_v56 = vld [vmem:[%s1263_s24 + $0xbd] sm:$0x7]  ;;  %v2260_v62 = vld [vmem:[%s1263_s24 + $0xc5] sm:$0xff]  ;;  %v833_v50 = vld [vmem:[%s1263_s24 + $0xcd] sm:$0x7] }
  0xa1   : > { %v789_v58 = vrot.slane %v786_v37, 2  ;;  %v792_v24 = vrot.slane %v786_v37, 4  ;;  %v2250_v35 = vmax.f32 %v2055_v29, %v818_v54  ;;  %v2253_v13 = vmax.f32 %v2061_v1, %v819_v31  ;;  %v834_v54 = vld [vmem:[%s1263_s24 + $0xd5] sm:$0xff] }
  0xa2   : > { %v850_v9 = vmax.f32 %v2064_v33, %v820_v39  ;;  %v795_v45 = vrot.slane %v786_v37, 6  ;;  %v800_v60 = vrot.slane %v2228_v15, 2  ;;  %v851_v53 = vmax.f32 %v2067_v2, %v821_v44 }
  0xa3   : > { %v791_v7 = vadd.f32 %v789_v58, %v786_v37  ;;  %v852_v29 = vmax.f32 %v2071_v38, %v822_v28  ;;  %v853_v8 = vmax.f32 %v2074_v42, %v823_v12  ;;  %v854_v1 = vmax.f32 %v2077_v49, %v824_v10 }
  0xa4   : > { %v855_v33 = vmax.f32 %v2080_v3, %v825_v25  ;;  %v856_v17 = vmax.f32 %v2085_v32, %v826_v55  ;;  %v857_v22 = vmax.f32 %v2088_v18, %v827_v48  ;;  %v858_v37 = vmax.f32 %v2091_v40, %v828_v27 }
  0xa5   : > { %v794_v43 = vadd.f32 %v792_v24, %v791_v7  ;;  %v859_v31 = vmax.f32 %v2095_v63, %v829_v5  ;;  %v860_v2 = vmax.f32 %v2098_v61, %v830_v30  ;;  %v861_v38 = vmax.f32 %v2101_v34, %v831_v56  ;;  %v2277_v49 = vpop.eup %1102  ;;  %v835_v24 = vld [vmem:[%s1263_s24 + $0xdd] sm:$0x7]  ;;  %v837_v30 = vld [vmem:[%s1263_s24 + $0xed] sm:$0x7] }
  0xa6   : > { %v862_v42 = vmax.f32 %v2104_v57, %v2260_v62  ;;  %v863_v32 = vmax.f32 %v2113_v41, %v833_v50  ;;  %v868_v39 = vmax.f32 %v838_v23, %v840_v6  ;;  %v869_v18 = vmax.f32 %v839_v52, %v841_v11 }
  0xa7   : > { %v797_v3 = vadd.f32 %v795_v45, %v794_v43  ;;  %v878_v40 = vmax.f32 %v2238_v46, %v846_v4  ;;  %v879_v44 = vmax.f32 %v845_v47, %v847_v14  ;;  %v890_v28 = vmax.f32 %v850_v9, %v852_v29  ;;  %v836_v45 = vld [vmem:[%s1263_s24 + $0xe5] sm:$0xff] }
  0xa8   : > { %v891_v63 = vmax.f32 %v851_v53, %v853_v8  ;;  %v864_v61 = vmax.f32 %v2122_v16, %v834_v54  ;;  %v870_v12 = vmax.f32 %v868_v39, %v842_v21  ;;  %v871_v58 = vmax.f32 %v869_v18, %v843_v0 }
  0xa9   : > { %v902_v34 = vmax.f32 %v856_v17, %v858_v37  ;;  %v880_v57 = vmax.f32 %v878_v40, %v2250_v35  ;;  %v881_v10 = vmax.f32 %v879_v44, %v2253_v13  ;;  %v892_v41 = vmax.f32 %v890_v28, %v854_v1 }
  0xaa   : > { %v893_v23 = vmax.f32 %v891_v63, %v855_v33  ;;  %v798_v52 = vadd.f32 %v797_v3, %v2228_v15  ;;  %v872_v6 = vmax.f32 %v870_v12, %v2238_v46  ;;  %v873_v11 = vmax.f32 %v871_v58, %v845_v47 }
  0xab   : > { %v903_v25 = vmax.f32 %v857_v22, %v859_v31  ;;  %v882_v55 = vmax.f32 %v880_v57, %v850_v9  ;;  %v883_v16 = vmax.f32 %v881_v10, %v851_v53  ;;  %v894_v21 = vmax.f32 %v892_v41, %v856_v17 }
  0xac   : > { %v895_v0 = vmax.f32 %v893_v23, %v857_v22  ;;  %v865_v48 = vmax.f32 %v2143_v26, %v835_v24  ;;  %v874_v27 = vmax.f32 %v872_v6, %v846_v4  ;;  %v875_v5 = vmax.f32 %v873_v11, %v847_v14 }
  0xad   : > { %v904_v7 = vmax.f32 %v902_v34, %v860_v2  ;;  %v884_v56 = vmax.f32 %v882_v55, %v852_v29  ;;  %v885_v62 = vmax.f32 %v883_v16, %v853_v8  ;;  %v896_v50 = vmax.f32 %v894_v21, %v858_v37 }
  0xae   : > { %v897_v43 = vmax.f32 %v895_v0, %v859_v31  ;;  %v802_v15 = vadd.f32 %v800_v60, %v798_v52  ;;  %v876_v46 = vmax.f32 %v874_v27, %v2250_v35  ;;  %v877_v47 = vmax.f32 %v875_v5, %v2253_v13 }
  0xaf   : > { %v905_v9 = vmax.f32 %v903_v25, %v861_v38  ;;  %v886_v53 = vmax.f32 %v884_v56, %v854_v1  ;;  %v887_v17 = vmax.f32 %v885_v62, %v855_v33  ;;  %v898_v22 = vmax.f32 %v896_v50, %v860_v2 }
  0xb0   : > { %v899_v54 = vmax.f32 %v897_v43, %v861_v38  ;;  %v866_v26 = vmax.f32 %v2163_v36, %v836_v45  ;;  %v867_v4 = vmax.f32 %v2172_v51, %v837_v30  ;;  %v906_v14 = vmax.f32 %v904_v7, %v862_v42 }
  0xb1   : > { %v907_v3 = vmax.f32 %v905_v9, %v863_v32  ;;  %1104 = vlog2.f32 %v2202_v19  ;;  %v888_v29 = vadd.f32 %v886_v53, %v876_v46  ;;  %v889_v8 = vadd.f32 %v887_v17, %v877_v47 }
  0xb2   : > { %v666_v35 = vadd.f32 1.0, %v665_v59  ;;  %v803_v60 = vmax.f32 %v802_v15, 0.0  ;;  %v908_v13 = vmax.f32 %v906_v14, %v864_v61  ;;  %v337_v59 = vmul.f32 0.6931472, %v2277_v49 }
  0xb3   : > { %v909_v37 = vmax.f32 %v907_v3, %v865_v48  ;;  %v900_v1 = vadd.f32 %v898_v22, %v888_v29  ;;  %v901_v33 = vadd.f32 %v899_v54, %v889_v8 }
  0xb4   : > { %v910_v31 = vmax.f32 %v908_v13, %v866_v26  ;;  %1106 = vlog2.f32 %v666_v35  ;;  %v804_v36 = vadd.f32 1.0, %v803_v60  ;;  %v339_v12 = vmul.f32 1.442695, %v337_v59 }
  0xb5   : > { %v911_v2 = vmax.f32 %v909_v37, %v867_v4 }
  0xb6   : > { %v912_v38 = vadd.f32 %v910_v31, %v900_v1  ;;  %1108 = vlog2.f32 %v804_v36 }
  0xb7   : > { %v913_v51 = vadd.f32 %v911_v2, %v901_v33 }
  0xb8   : > { %v915_v42 = vrot.slane %v912_v38, 3  ;;  %v918_v32 = vrot.slane %v912_v38, 6 }
  0xb9   : > { %v922_v39 = vrot.slane %v913_v51, 1 }
  0xba   : > { %v917_v19 = vadd.f32 %v915_v42, %v912_v38 }
  0xbb   : > { %v1105_v18 = vpop.eup %1104 }
  0xbc   : > { %v920_v40 = vadd.f32 %v918_v32, %v917_v19  ;;  %v527_v44 = vmul.f32 0.6931472, %v1105_v18 }
  0xbe   : > { %v924_v20 = vadd.f32 %v922_v39, %v920_v40  ;;  %v1107_v28 = vpop.eup %1106  ;;  %v528_v58 = vmul.f32 1.442695, %v527_v44 }
  0xbf   : > { %v668_v34 = vmul.f32 0.6931472, %v1107_v28 }
  0xc0   : > { %v925_v63 = vmax.f32 %v924_v20, 0.0  ;;  %v1109_v24 = vpop.eup %1108  ;;  %v930_v41 = vadd.f32 %v528_v58, %v339_v12 }
  0xc1   : > { %v669_v57 = vmul.f32 1.442695, %v668_v34  ;;  %v806_v10 = vmul.f32 0.6931472, %v1109_v24 }
  0xc2   : > { %v926_v61 = vadd.f32 1.0, %v925_v63 }
  0xc3   : > { %v807_v23 = vmul.f32 1.442695, %v806_v10  ;;  %v931_v52 = vadd.f32 %v930_v41, %v669_v57 }
  0xc4   : > { %1110 = vlog2.f32 %v926_v61 }
  0xc5   : > { %v932_v25 = vadd.f32 %v931_v52, %v807_v23 }
  0xce   : > { %v1111_v6 = vpop.eup %1110 }
  0xcf   : > { %v928_v11 = vmul.f32 0.6931472, %v1111_v6 }
  0xd1   : > { %v929_v55 = vmul.f32 1.442695, %v928_v11 }
  0xd3   : > { %v933_v49 = vadd.f32 %v932_v25, %v929_v55 }
  0xd5   : > { %v934_v16 = vmul.f32 0.2, %v933_v49 }
  0xd7   : > { %v935_v21 = vsub.f32 %v339_v12, %v934_v16  ;;  %v937_v0 = vsub.f32 %v528_v58, %v934_v16  ;;  %v940_v48 = vsub.f32 %v669_v57, %v934_v16  ;;  %v943_v27 = vsub.f32 %v807_v23, %v934_v16 }
  0xd8   : > { %v946_v30 = vsub.f32 %v929_v55, %v934_v16 }
  0xd9   : > { %v936_v5 = vmul.f32 0.8983706, %v935_v21  ;;  %v938_v7 = vmul.f32 0.3134081, %v937_v0  ;;  %v941_v45 = vmul.f32 -0.101629384, %v940_v48 }
  0xda   : > { %v944_v62 = vmul.f32 -0.4235575, %v943_v27  ;;  %v947_v43 = vmul.f32 -0.68659186, %v946_v30 }
  0xdb   : > { %v939_v56 = vadd.f32 %v938_v7, %v936_v5 }
  0xdd   : > { %v942_v50 = vadd.f32 %v941_v45, %v939_v56 }
  0xdf   : > { %v945_v15 = vadd.f32 %v944_v62, %v942_v50 }
  0xe1   : > { %v948_v46 = vadd.f32 %v947_v43, %v945_v15 }
  0xe3   : > { %v949_v47 = vmul.f32 0.6383934, %v948_v46 }
  0xe5   : > { %951 = vst.msk [vmem:[%s130_s27] sm:$0x1] %vm950_vm3, %v949_v47 }
  0xe6   : > { %1125 = shalt.err (!%p1122_p5)
}
  0xe7   : > { %s1126_s13 = scalar_lea.hbm %s2303_s2, 16  ;;  %s1130_s20 = scalar_lea.hbm %s2351_s1, 32 }
  0xe8   : > { %p1127_p6 = scmp.ne.s32.totalorder %s2303_s2, %s1126_s13  ;;  %p1131_p10 = scmp.lt.u32.totalorder %s2303_s2, %s2351_s1 }
  0xe9   : > { %p1132_p11 = scmp.lt.u32.totalorder %s1130_s20, %s1126_s13  ;;  %p1134_p13 = scmp.lt.u32.totalorder %s1126_s13, %s2303_s2 }
  0xea   : > { %p1128_p7 = pnand %p1127_p6, %p1243_p4 }
  0xeb   : > { %p1133_p12 = por %p1132_p11, %p1131_p10 }
  0xec   : > { %p1129_p9 = pneg %p1128_p7 }
  0xed   : > { %p1135_p0 = por %p1134_p13, %p1133_p12 }
  0xef   : > { %p1136_p1 = pnand %p1135_p0, %p1129_p9 }
  0xf1   : > { %1139 = shalt.err (!%p1136_p1)
}
  0xf2   : > { %1047 = dma.vmem_to_hbm [thread:$0]  (%p1243_p4), %s2305_s28, 16, %s2303_s2, %s953_s3  }
  0xf3 PF: > { %p1053_p2 = scmp.ge.s32.totalorder %s1190_s11, 2  ;;  %s978_s23 = sand.u32 1, %s1170_s6  }
  0xf4   : > { %s979_s24 = scalar_lea.sflag [#allocation3], %s978_s23 }
  0xf5   : > { %p1050_p3 = pnand %p1053_p2, %p1250_p8 }
  0xf7   : > { %1165 = dma.done.wait (!%p1050_p3), %s979_s24, 16  }
  0xf8   : > { %1167 = vsyncadd (!%p1050_p3), %s979_s24, 4294967280  ;;  %s14_s11 = sadd.s32 1, %s1190_s11   ;;  %s2431_s6 = smov %s1174_s7 }
  0xf9   : > { %p11_p5 = scmp.ge.s32.totalorder %s14_s11, 4   ;;  %s2432_s7 = smov %s1178_s8 }
  0xfa   : > { %s2433_s8 = smov %s1256_s19  ;;  %s2434_s9 = smov %s1186_s10 }
  0xfb   : > { %s2435_s10 = smov %s2437_s14  ;;  %13 = sbr.rel (!%p11_p5) target bundleno = 4 (0x4), region = 59 }
 0x102   :  { %983 = vsyncpa [#allocation3], 1 }
 0x103   :  { %985 = vsyncpa [#allocation3 + $0x1], 1 }

</bundles_post_ra>
